<compile_context>
chip_gen: v7x
topology: tpu7x:2x2x1
jax: 0.10.0
libtpu: 0.0.40
codegen_flags: <defaults>
</compile_context>

<pallas_src>
import functools

import numpy as np
import jax
import jax.numpy as jnp
from jax.experimental import pallas as pl
from jax.experimental.pallas import tpu as pltpu


def _leaky(v):
    # torch.nn.functional.leaky_relu default negative_slope = 0.01
    return jnp.where(v >= 0, v, 0.01 * v)


def _interp_matrix(L_out, L_in):
    # Per-axis weights of PyTorch bilinear upsample with align_corners=True.
    M = np.zeros((L_out, L_in), np.float32)
    scale = (L_in - 1) / (L_out - 1)
    for i in range(L_out):
        src = i * scale
        i0 = min(int(np.floor(src)), L_in - 1)
        i1 = min(i0 + 1, L_in - 1)
        f = src - i0
        M[i, i0] += 1.0 - f
        M[i, i1] += f
    return M


def _upsample_matrix(H, W):
    # Kt[p*W+q, i*W+j] = A[i,p]*B[j,q] for p < H-1, q < W-1, else 0; so a
    # flattened (C, HW) max-pooled map (pool value of (p,q) stored at p*W+q,
    # wrapped garbage in the last row/col) matmul'd with Kt yields the
    # bilinear upsample (garbage rows hit zero rows of Kt).
    A = _interp_matrix(H, H - 1)
    B = _interp_matrix(W, W - 1)
    Kt = np.zeros((H * W, H * W), np.float32)
    for p in range(H - 1):
        for q in range(W - 1):
            Kt[p * W + q] = np.kron(A[:, p], B[:, q])
    # TODO(synk): at large H*W replace this (HW, HW) Kronecker matrix with two
    # separable row/column interpolation matmuls.
    return Kt


def _tap_masks(H, W):
    # masks[(ky+2)*5 + (kx+2), y*W + x] = 1 iff (y+ky, x+kx) is inside the image.
    m = np.zeros((25, H * W), np.float32)
    for ky in range(-2, 3):
        for kx in range(-2, 3):
            v = np.zeros((H, W), np.float32)
            v[max(0, -ky):min(H, H - ky), max(0, -kx):min(W, W - kx)] = 1.0
            m[(ky + 2) * 5 + (kx + 2)] = v.reshape(-1)
    return m


def _inception_kernel(H, W, Cin, Cout,
                      x_ref,
                      w1_ref, b1_ref,
                      w31_ref, b31_ref, w32_ref, b32_ref,
                      w51_ref, b51_ref, w52_ref, b52_ref,
                      wp_ref, bp_ref, kt_ref, mask_ref,
                      out_ref):
    HW = H * W
    x = x_ref[...]                                           # (Cin, HW)

    def tap(t, ky, kx):
        # Shift so position y*W+x holds t[:, (y+ky)*W + (x+kx)], zeroed where
        # the source pixel falls outside the image (conv zero padding).
        d = ky * W + kx
        s = t if d == 0 else pltpu.roll(t, (-d) % HW, axis=1)
        m = mask_ref[pl.ds((ky + 2) * 5 + (kx + 2), 1), :]   # (1, HW)
        return s * m

    # ---- branch 1: 1x1 conv + leaky_relu --------------------------------
    y1 = _leaky(jnp.dot(w1_ref[...], x,
                        preferred_element_type=jnp.float32) + b1_ref[...])

    # ---- branch 2: 1x1 conv -> 3x3 conv (pad=1) -> leaky_relu -----------
    t2 = jnp.dot(w31_ref[...], x,
                 preferred_element_type=jnp.float32) + b31_ref[...]
    im3 = jnp.concatenate(
        [tap(t2, ky, kx) for ky in (-1, 0, 1) for kx in (-1, 0, 1)], axis=0)
    y2 = _leaky(jnp.dot(w32_ref[...], im3,                   # (Cout, 9*Cout)@(9*Cout, HW)
                        preferred_element_type=jnp.float32) + b32_ref[...])

    # ---- branch 3: 1x1 conv -> 5x5 conv (pad=2) -> leaky_relu -----------
    t3 = jnp.dot(w51_ref[...], x,
                 preferred_element_type=jnp.float32) + b51_ref[...]
    im5 = jnp.concatenate(
        [tap(t3, ky, kx)
         for ky in (-2, -1, 0, 1, 2) for kx in (-2, -1, 0, 1, 2)], axis=0)
    y3 = _leaky(jnp.dot(w52_ref[...], im5,                   # (Cout, 25*Cout)@(25*Cout, HW)
                        preferred_element_type=jnp.float32) + b52_ref[...])

    # ---- branch 4: maxpool(2, stride=1) -> bilinear up (align_corners=True)
    #                -> 1x1 conv -> leaky_relu ----------------------------
    # 2x2/stride-1 maxpool over all channels at once; wrapped values in the
    # last row/col are discarded by the zero rows of the interpolation matrix.
    pool = jnp.maximum(
        jnp.maximum(x, pltpu.roll(x, HW - 1, axis=1)),
        jnp.maximum(pltpu.roll(x, HW - W, axis=1),
                    pltpu.roll(x, HW - W - 1, axis=1)))
    # 1x1 conv (channel mix) commutes with the linear upsample -> mix first.
    mixed = jnp.dot(wp_ref[...], pool, preferred_element_type=jnp.float32)
    y4 = _leaky(jnp.dot(mixed, kt_ref[...],
                        preferred_element_type=jnp.float32) + bp_ref[...])

    # Single lane-dense output slab (4*Cout, HW); all stores unmasked.
    out_ref[0 * Cout:1 * Cout, :] = y1
    out_ref[1 * Cout:2 * Cout, :] = y2
    out_ref[2 * Cout:3 * Cout, :] = y3
    out_ref[3 * Cout:4 * Cout, :] = y4


def inception_module_pallas(x_nchw, params):
    N, Cin, H, W = x_nchw.shape
    Cout = params["w1"].shape[1]
    HW = H * W

    # Channels-first, spatially flattened: pure reshape, no transposes.
    xr = x_nchw.reshape(N, Cin, HW)

    # Weights pre-arranged for (Cout, HW) = Wt @ (Cin, HW) matmuls.
    w1t = params["w1"].T
    w31t = params["w31"].T
    w51t = params["w51"].T
    wpt = params["wp"].T
    w32r = params["w32"].transpose(3, 0, 1, 2).reshape(Cout, 9 * Cout)
    w52r = params["w52"].transpose(3, 0, 1, 2).reshape(Cout, 25 * Cout)
    b1 = params["b1"].reshape(Cout, 1)
    b31 = params["b31"].reshape(Cout, 1)
    b32 = params["b32"].reshape(Cout, 1)
    b51 = params["b51"].reshape(Cout, 1)
    b52 = params["b52"].reshape(Cout, 1)
    bp = params["bp"].reshape(Cout, 1)

    kt = jnp.asarray(_upsample_matrix(H, W))        # (HW, HW)
    masks = jnp.asarray(_tap_masks(H, W))           # (25, HW)

    kernel = functools.partial(_inception_kernel, H, W, Cin, Cout)

    def rep(shape):
        return pl.BlockSpec(shape, lambda n, _k=len(shape): (0,) * _k)

    # TODO(synk): at realistic resolutions tile the grid over HW row-blocks
    # (with a 2-row halo for the 5x5 taps) and set vmem_limit_bytes from the
    # v7x 64 MiB budget; at this test size whole-frame blocks fit easily.
    out = pl.pallas_call(
        kernel,
        grid=(N,),
        in_specs=[
            pl.BlockSpec((None, Cin, HW), lambda n: (n, 0, 0)),   # x
            rep((Cout, Cin)), rep((Cout, 1)),                     # w1t, b1
            rep((Cout, Cin)), rep((Cout, 1)),                     # w31t, b31
            rep((Cout, 9 * Cout)), rep((Cout, 1)),                # w32r, b32
            rep((Cout, Cin)), rep((Cout, 1)),                     # w51t, b51
            rep((Cout, 25 * Cout)), rep((Cout, 1)),               # w52r, b52
            rep((Cout, Cin)), rep((Cout, 1)),                     # wpt, bp
            rep((HW, HW)),                                        # kt
            rep((25, HW)),                                        # masks
        ],
        out_specs=pl.BlockSpec((None, 4 * Cout, HW), lambda n: (n, 0, 0)),
        out_shape=jax.ShapeDtypeStruct((N, 4 * Cout, HW), jnp.float32),
        compiler_params=pltpu.CompilerParams(
            dimension_semantics=("parallel",)),
    )(xr, w1t, b1, w31t, b31, w32r, b32, w51t, b51, w52r, b52, wpt, bp,
      kt, masks)

    return out.reshape(N, 4 * Cout, H, W)               # NCHW, pure reshape


# --------------------------- pure-JAX reference ---------------------------
def inception_module_ref(x_nchw, params):
    N, Cin, H, W = x_nchw.shape
    x = jnp.transpose(x_nchw, (0, 2, 3, 1))             # NHWC

    def conv(v, w_hwio, b, pad):
        y = jax.lax.conv_general_dilated(
            v, w_hwio, window_strides=(1, 1),
            padding=[(pad, pad), (pad, pad)],
            dimension_numbers=("NHWC", "HWIO", "NHWC"),
            precision=jax.lax.Precision.HIGHEST)
        return y + b.reshape(1, 1, 1, -1)

    def w1x1(w):
        return w.reshape(1, 1, *w.shape)

    x1 = _leaky(conv(x, w1x1(params["w1"]), params["b1"], 0))
    x2 = _leaky(conv(conv(x, w1x1(params["w31"]), params["b31"], 0),
                     params["w32"], params["b32"], 1))
    x3 = _leaky(conv(conv(x, w1x1(params["w51"]), params["b51"], 0),
                     params["w52"], params["b52"], 2))

    p = jax.lax.reduce_window(x, -jnp.inf, jax.lax.max,
                              (1, 2, 2, 1), (1, 1, 1, 1), "VALID")
    A = jnp.asarray(_interp_matrix(H, H - 1))
    Bm = jnp.asarray(_interp_matrix(W, W - 1))
    up = jnp.einsum("ip,jq,npqc->nijc", A, Bm, p,
                    precision=jax.lax.Precision.HIGHEST)
    x4 = _leaky(conv(up, w1x1(params["wp"]), params["bp"], 0))

    out = jnp.concatenate([x1, x2, x3, x4], axis=-1)
    return jnp.transpose(out, (0, 3, 1, 2))             # NCHW


def init_params(key, Cin, Cout):
    ks = jax.random.split(key, 12)

    def nrm(k, shape, scale):
        return (scale * jax.random.normal(k, shape)).astype(jnp.float32)

    return {
        "w1":  nrm(ks[0], (Cin, Cout), 0.4),  "b1":  nrm(ks[1], (1, Cout), 0.1),
        "w31": nrm(ks[2], (Cin, Cout), 0.4),  "b31": nrm(ks[3], (1, Cout), 0.1),
        "w32": nrm(ks[4], (3, 3, Cout, Cout), 0.2), "b32": nrm(ks[5], (1, Cout), 0.1),
        "w51": nrm(ks[6], (Cin, Cout), 0.4),  "b51": nrm(ks[7], (1, Cout), 0.1),
        "w52": nrm(ks[8], (5, 5, Cout, Cout), 0.15), "b52": nrm(ks[9], (1, Cout), 0.1),
        "wp":  nrm(ks[10], (Cin, Cout), 0.4), "bp":  nrm(ks[11], (Cout,), 0.1),
    }


if __name__ == "__main__":
    key = jax.random.PRNGKey(0)
    kx, kp = jax.random.split(key)
    N, Cin, Cout, H, W = 2, 4, 8, 16, 16

    x = jax.random.normal(kx, (N, Cin, H, W), dtype=jnp.float32)
    params = init_params(kp, Cin, Cout)

    out = inception_module_pallas(x, params)
    out = jax.block_until_ready(out)

    ref = inception_module_ref(x, params)
    assert out.shape == (N, 4 * Cout, H, W), out.shape
    np.testing.assert_allclose(np.asarray(out), np.asarray(ref),
                               rtol=1e-2, atol=1e-2)
    print("KERNEL_OK")
</pallas_src>

<mosaic_0001>
module attributes {stable_mosaic.version = 11 : i64} {
  func.func @_inception_kernel(%arg0: i32, %arg1: memref<1x4x256xf32, #tpu.memory_space<vmem>>, %arg2: memref<8x4xf32, #tpu.memory_space<vmem>>, %arg3: memref<8x1xf32, #tpu.memory_space<vmem>>, %arg4: memref<8x4xf32, #tpu.memory_space<vmem>>, %arg5: memref<8x1xf32, #tpu.memory_space<vmem>>, %arg6: memref<8x72xf32, #tpu.memory_space<vmem>>, %arg7: memref<8x1xf32, #tpu.memory_space<vmem>>, %arg8: memref<8x4xf32, #tpu.memory_space<vmem>>, %arg9: memref<8x1xf32, #tpu.memory_space<vmem>>, %arg10: memref<8x200xf32, #tpu.memory_space<vmem>>, %arg11: memref<8x1xf32, #tpu.memory_space<vmem>>, %arg12: memref<8x4xf32, #tpu.memory_space<vmem>>, %arg13: memref<8x1xf32, #tpu.memory_space<vmem>>, %arg14: memref<256x256xf32, #tpu.memory_space<vmem>>, %arg15: memref<25x256xf32, #tpu.memory_space<vmem>>, %arg16: memref<1x32x256xf32, #tpu.memory_space<vmem>>) attributes {dimension_semantics = [#tpu.dimension_semantics<parallel>], iteration_bounds = array<i64: 2>, scalar_prefetch = 0 : i64, scratch_operands = 0 : i64, tpu.core_type = #tpu.core_type<tc>, window_params = [{transform_indices = @transform_0, window_bounds = array<i64: 1, 4, 256>}, {pipeline_mode = #tpu.pipeline_mode<synchronous>, transform_indices = @transform_1, window_bounds = array<i64: 8, 4>}, {pipeline_mode = #tpu.pipeline_mode<synchronous>, transform_indices = @transform_2, window_bounds = array<i64: 8, 1>}, {pipeline_mode = #tpu.pipeline_mode<synchronous>, transform_indices = @transform_3, window_bounds = array<i64: 8, 4>}, {pipeline_mode = #tpu.pipeline_mode<synchronous>, transform_indices = @transform_4, window_bounds = array<i64: 8, 1>}, {pipeline_mode = #tpu.pipeline_mode<synchronous>, transform_indices = @transform_5, window_bounds = array<i64: 8, 72>}, {pipeline_mode = #tpu.pipeline_mode<synchronous>, transform_indices = @transform_6, window_bounds = array<i64: 8, 1>}, {pipeline_mode = #tpu.pipeline_mode<synchronous>, transform_indices = @transform_7, window_bounds = array<i64: 8, 4>}, {pipeline_mode = #tpu.pipeline_mode<synchronous>, transform_indices = @transform_8, window_bounds = array<i64: 8, 1>}, {pipeline_mode = #tpu.pipeline_mode<synchronous>, transform_indices = @transform_9, window_bounds = array<i64: 8, 200>}, {pipeline_mode = #tpu.pipeline_mode<synchronous>, transform_indices = @transform_10, window_bounds = array<i64: 8, 1>}, {pipeline_mode = #tpu.pipeline_mode<synchronous>, transform_indices = @transform_11, window_bounds = array<i64: 8, 4>}, {pipeline_mode = #tpu.pipeline_mode<synchronous>, transform_indices = @transform_12, window_bounds = array<i64: 8, 1>}, {pipeline_mode = #tpu.pipeline_mode<synchronous>, transform_indices = @transform_13, window_bounds = array<i64: 256, 256>}, {pipeline_mode = #tpu.pipeline_mode<synchronous>, transform_indices = @transform_14, window_bounds = array<i64: 25, 256>}, {transform_indices = @transform_15, window_bounds = array<i64: 1, 32, 256>}]} {
    %c0 = arith.constant 0 : index
    %c0_0 = arith.constant 0 : index
    %c0_1 = arith.constant 0 : index
    %0 = vector.load %arg1[%c0, %c0_0, %c0_1] : memref<1x4x256xf32, #tpu.memory_space<vmem>>, vector<1x4x256xf32>
    %1 = vector.shape_cast %0 : vector<1x4x256xf32> to vector<4x256xf32>
    %c0_2 = arith.constant 0 : index
    %c0_3 = arith.constant 0 : index
    %2 = vector.load %arg2[%c0_2, %c0_3] : memref<8x4xf32, #tpu.memory_space<vmem>>, vector<8x4xf32>
    %cst = arith.constant dense<0.000000e+00> : vector<8x256xf32>
    %3 = tpu.matmul %2, %1, %cst {dimension_numbers = #tpu.dot_dimension_numbers<[1], [0], [0], [1], [0, 0, 1, 1], [], []>} : vector<8x4xf32>, vector<4x256xf32>, vector<8x256xf32> -> vector<8x256xf32>
    %c0_4 = arith.constant 0 : index
    %c0_5 = arith.constant 0 : index
    %4 = vector.load %arg3[%c0_4, %c0_5] : memref<8x1xf32, #tpu.memory_space<vmem>>, vector<8x1xf32>
    %5 = vector.broadcast %4 : vector<8x1xf32> to vector<8x256xf32>
    %6 = arith.addf %3, %5 : vector<8x256xf32>
    %cst_6 = arith.constant 0.000000e+00 : f32
    %7 = vector.broadcast %cst_6 : f32 to vector<8x256xf32>
    %8 = arith.cmpf oge, %6, %7 : vector<8x256xf32>
    %cst_7 = arith.constant 0.00999999977 : f32
    %9 = vector.broadcast %cst_7 : f32 to vector<8x256xf32>
    %10 = arith.mulf %9, %6 : vector<8x256xf32>
    %11 = arith.select %8, %6, %10 : vector<8x256xi1>, vector<8x256xf32>
    %c0_8 = arith.constant 0 : index
    %c0_9 = arith.constant 0 : index
    %12 = vector.load %arg4[%c0_8, %c0_9] : memref<8x4xf32, #tpu.memory_space<vmem>>, vector<8x4xf32>
    %cst_10 = arith.constant dense<0.000000e+00> : vector<8x256xf32>
    %13 = tpu.matmul %12, %1, %cst_10 {dimension_numbers = #tpu.dot_dimension_numbers<[1], [0], [0], [1], [0, 0, 1, 1], [], []>} : vector<8x4xf32>, vector<4x256xf32>, vector<8x256xf32> -> vector<8x256xf32>
    %c0_11 = arith.constant 0 : index
    %c0_12 = arith.constant 0 : index
    %14 = vector.load %arg5[%c0_11, %c0_12] : memref<8x1xf32, #tpu.memory_space<vmem>>, vector<8x1xf32>
    %15 = vector.broadcast %14 : vector<8x1xf32> to vector<8x256xf32>
    %16 = arith.addf %13, %15 : vector<8x256xf32>
    %c17_i32 = arith.constant 17 : i32
    %17 = tpu.dynamic_rotate %16 by %c17_i32 dim 1 : vector<8x256xf32>, i32 -> vector<8x256xf32>
    %c6 = arith.constant 6 : index
    %c0_13 = arith.constant 0 : index
    %18 = vector.load %arg15[%c6, %c0_13] : memref<25x256xf32, #tpu.memory_space<vmem>>, vector<1x256xf32>
    %19 = vector.broadcast %18 : vector<1x256xf32> to vector<8x256xf32>
    %20 = arith.mulf %17, %19 : vector<8x256xf32>
    %c16_i32 = arith.constant 16 : i32
    %21 = tpu.dynamic_rotate %16 by %c16_i32 dim 1 : vector<8x256xf32>, i32 -> vector<8x256xf32>
    %c7 = arith.constant 7 : index
    %c0_14 = arith.constant 0 : index
    %22 = vector.load %arg15[%c7, %c0_14] : memref<25x256xf32, #tpu.memory_space<vmem>>, vector<1x256xf32>
    %23 = vector.broadcast %22 : vector<1x256xf32> to vector<8x256xf32>
    %24 = arith.mulf %21, %23 : vector<8x256xf32>
    %c15_i32 = arith.constant 15 : i32
    %25 = tpu.dynamic_rotate %16 by %c15_i32 dim 1 : vector<8x256xf32>, i32 -> vector<8x256xf32>
    %c8 = arith.constant 8 : index
    %c0_15 = arith.constant 0 : index
    %26 = vector.load %arg15[%c8, %c0_15] : memref<25x256xf32, #tpu.memory_space<vmem>>, vector<1x256xf32>
    %27 = vector.broadcast %26 : vector<1x256xf32> to vector<8x256xf32>
    %28 = arith.mulf %25, %27 : vector<8x256xf32>
    %c1_i32 = arith.constant 1 : i32
    %29 = tpu.dynamic_rotate %16 by %c1_i32 dim 1 : vector<8x256xf32>, i32 -> vector<8x256xf32>
    %c11 = arith.constant 11 : index
    %c0_16 = arith.constant 0 : index
    %30 = vector.load %arg15[%c11, %c0_16] : memref<25x256xf32, #tpu.memory_space<vmem>>, vector<1x256xf32>
    %31 = vector.broadcast %30 : vector<1x256xf32> to vector<8x256xf32>
    %32 = arith.mulf %29, %31 : vector<8x256xf32>
    %c12 = arith.constant 12 : index
    %c0_17 = arith.constant 0 : index
    %33 = vector.load %arg15[%c12, %c0_17] : memref<25x256xf32, #tpu.memory_space<vmem>>, vector<1x256xf32>
    %34 = vector.broadcast %33 : vector<1x256xf32> to vector<8x256xf32>
    %35 = arith.mulf %16, %34 : vector<8x256xf32>
    %c255_i32 = arith.constant 255 : i32
    %36 = tpu.dynamic_rotate %16 by %c255_i32 dim 1 : vector<8x256xf32>, i32 -> vector<8x256xf32>
    %c13 = arith.constant 13 : index
    %c0_18 = arith.constant 0 : index
    %37 = vector.load %arg15[%c13, %c0_18] : memref<25x256xf32, #tpu.memory_space<vmem>>, vector<1x256xf32>
    %38 = vector.broadcast %37 : vector<1x256xf32> to vector<8x256xf32>
    %39 = arith.mulf %36, %38 : vector<8x256xf32>
    %c241_i32 = arith.constant 241 : i32
    %40 = tpu.dynamic_rotate %16 by %c241_i32 dim 1 : vector<8x256xf32>, i32 -> vector<8x256xf32>
    %c16 = arith.constant 16 : index
    %c0_19 = arith.constant 0 : index
    %41 = vector.load %arg15[%c16, %c0_19] : memref<25x256xf32, #tpu.memory_space<vmem>>, vector<1x256xf32>
    %42 = vector.broadcast %41 : vector<1x256xf32> to vector<8x256xf32>
    %43 = arith.mulf %40, %42 : vector<8x256xf32>
    %c240_i32 = arith.constant 240 : i32
    %44 = tpu.dynamic_rotate %16 by %c240_i32 dim 1 : vector<8x256xf32>, i32 -> vector<8x256xf32>
    %c17 = arith.constant 17 : index
    %c0_20 = arith.constant 0 : index
    %45 = vector.load %arg15[%c17, %c0_20] : memref<25x256xf32, #tpu.memory_space<vmem>>, vector<1x256xf32>
    %46 = vector.broadcast %45 : vector<1x256xf32> to vector<8x256xf32>
    %47 = arith.mulf %44, %46 : vector<8x256xf32>
    %c239_i32 = arith.constant 239 : i32
    %48 = tpu.dynamic_rotate %16 by %c239_i32 dim 1 : vector<8x256xf32>, i32 -> vector<8x256xf32>
    %c18 = arith.constant 18 : index
    %c0_21 = arith.constant 0 : index
    %49 = vector.load %arg15[%c18, %c0_21] : memref<25x256xf32, #tpu.memory_space<vmem>>, vector<1x256xf32>
    %50 = vector.broadcast %49 : vector<1x256xf32> to vector<8x256xf32>
    %51 = arith.mulf %48, %50 : vector<8x256xf32>
    %52 = tpu.concatenate %20, %24, %28, %32, %35, %39, %43, %47, %51 in 0 : vector<8x256xf32>, vector<8x256xf32>, vector<8x256xf32>, vector<8x256xf32>, vector<8x256xf32>, vector<8x256xf32>, vector<8x256xf32>, vector<8x256xf32>, vector<8x256xf32> -> vector<72x256xf32>
    %c0_22 = arith.constant 0 : index
    %c0_23 = arith.constant 0 : index
    %53 = vector.load %arg6[%c0_22, %c0_23] : memref<8x72xf32, #tpu.memory_space<vmem>>, vector<8x72xf32>
    %cst_24 = arith.constant dense<0.000000e+00> : vector<8x256xf32>
    %54 = tpu.matmul %53, %52, %cst_24 {dimension_numbers = #tpu.dot_dimension_numbers<[1], [0], [0], [1], [0, 0, 1, 1], [], []>} : vector<8x72xf32>, vector<72x256xf32>, vector<8x256xf32> -> vector<8x256xf32>
    %c0_25 = arith.constant 0 : index
    %c0_26 = arith.constant 0 : index
    %55 = vector.load %arg7[%c0_25, %c0_26] : memref<8x1xf32, #tpu.memory_space<vmem>>, vector<8x1xf32>
    %56 = vector.broadcast %55 : vector<8x1xf32> to vector<8x256xf32>
    %57 = arith.addf %54, %56 : vector<8x256xf32>
    %cst_27 = arith.constant 0.000000e+00 : f32
    %58 = vector.broadcast %cst_27 : f32 to vector<8x256xf32>
    %59 = arith.cmpf oge, %57, %58 : vector<8x256xf32>
    %cst_28 = arith.constant 0.00999999977 : f32
    %60 = vector.broadcast %cst_28 : f32 to vector<8x256xf32>
    %61 = arith.mulf %60, %57 : vector<8x256xf32>
    %62 = arith.select %59, %57, %61 : vector<8x256xi1>, vector<8x256xf32>
    %c0_29 = arith.constant 0 : index
    %c0_30 = arith.constant 0 : index
    %63 = vector.load %arg8[%c0_29, %c0_30] : memref<8x4xf32, #tpu.memory_space<vmem>>, vector<8x4xf32>
    %cst_31 = arith.constant dense<0.000000e+00> : vector<8x256xf32>
    %64 = tpu.matmul %63, %1, %cst_31 {dimension_numbers = #tpu.dot_dimension_numbers<[1], [0], [0], [1], [0, 0, 1, 1], [], []>} : vector<8x4xf32>, vector<4x256xf32>, vector<8x256xf32> -> vector<8x256xf32>
    %c0_32 = arith.constant 0 : index
    %c0_33 = arith.constant 0 : index
    %65 = vector.load %arg9[%c0_32, %c0_33] : memref<8x1xf32, #tpu.memory_space<vmem>>, vector<8x1xf32>
    %66 = vector.broadcast %65 : vector<8x1xf32> to vector<8x256xf32>
    %67 = arith.addf %64, %66 : vector<8x256xf32>
    %c34_i32 = arith.constant 34 : i32
    %68 = tpu.dynamic_rotate %67 by %c34_i32 dim 1 : vector<8x256xf32>, i32 -> vector<8x256xf32>
    %c0_34 = arith.constant 0 : index
    %c0_35 = arith.constant 0 : index
    %69 = vector.load %arg15[%c0_34, %c0_35] : memref<25x256xf32, #tpu.memory_space<vmem>>, vector<1x256xf32>
    %70 = vector.broadcast %69 : vector<1x256xf32> to vector<8x256xf32>
    %71 = arith.mulf %68, %70 : vector<8x256xf32>
    %c33_i32 = arith.constant 33 : i32
    %72 = tpu.dynamic_rotate %67 by %c33_i32 dim 1 : vector<8x256xf32>, i32 -> vector<8x256xf32>
    %c1 = arith.constant 1 : index
    %c0_36 = arith.constant 0 : index
    %73 = vector.load %arg15[%c1, %c0_36] : memref<25x256xf32, #tpu.memory_space<vmem>>, vector<1x256xf32>
    %74 = vector.broadcast %73 : vector<1x256xf32> to vector<8x256xf32>
    %75 = arith.mulf %72, %74 : vector<8x256xf32>
    %c32_i32 = arith.constant 32 : i32
    %76 = tpu.dynamic_rotate %67 by %c32_i32 dim 1 : vector<8x256xf32>, i32 -> vector<8x256xf32>
    %c2 = arith.constant 2 : index
    %c0_37 = arith.constant 0 : index
    %77 = vector.load %arg15[%c2, %c0_37] : memref<25x256xf32, #tpu.memory_space<vmem>>, vector<1x256xf32>
    %78 = vector.broadcast %77 : vector<1x256xf32> to vector<8x256xf32>
    %79 = arith.mulf %76, %78 : vector<8x256xf32>
    %c31_i32 = arith.constant 31 : i32
    %80 = tpu.dynamic_rotate %67 by %c31_i32 dim 1 : vector<8x256xf32>, i32 -> vector<8x256xf32>
    %c3 = arith.constant 3 : index
    %c0_38 = arith.constant 0 : index
    %81 = vector.load %arg15[%c3, %c0_38] : memref<25x256xf32, #tpu.memory_space<vmem>>, vector<1x256xf32>
    %82 = vector.broadcast %81 : vector<1x256xf32> to vector<8x256xf32>
    %83 = arith.mulf %80, %82 : vector<8x256xf32>
    %c30_i32 = arith.constant 30 : i32
    %84 = tpu.dynamic_rotate %67 by %c30_i32 dim 1 : vector<8x256xf32>, i32 -> vector<8x256xf32>
    %c4 = arith.constant 4 : index
    %c0_39 = arith.constant 0 : index
    %85 = vector.load %arg15[%c4, %c0_39] : memref<25x256xf32, #tpu.memory_space<vmem>>, vector<1x256xf32>
    %86 = vector.broadcast %85 : vector<1x256xf32> to vector<8x256xf32>
    %87 = arith.mulf %84, %86 : vector<8x256xf32>
    %c18_i32 = arith.constant 18 : i32
    %88 = tpu.dynamic_rotate %67 by %c18_i32 dim 1 : vector<8x256xf32>, i32 -> vector<8x256xf32>
    %c5 = arith.constant 5 : index
    %c0_40 = arith.constant 0 : index
    %89 = vector.load %arg15[%c5, %c0_40] : memref<25x256xf32, #tpu.memory_space<vmem>>, vector<1x256xf32>
    %90 = vector.broadcast %89 : vector<1x256xf32> to vector<8x256xf32>
    %91 = arith.mulf %88, %90 : vector<8x256xf32>
    %c17_i32_41 = arith.constant 17 : i32
    %92 = tpu.dynamic_rotate %67 by %c17_i32_41 dim 1 : vector<8x256xf32>, i32 -> vector<8x256xf32>
    %c6_42 = arith.constant 6 : index
    %c0_43 = arith.constant 0 : index
    %93 = vector.load %arg15[%c6_42, %c0_43] : memref<25x256xf32, #tpu.memory_space<vmem>>, vector<1x256xf32>
    %94 = vector.broadcast %93 : vector<1x256xf32> to vector<8x256xf32>
    %95 = arith.mulf %92, %94 : vector<8x256xf32>
    %c16_i32_44 = arith.constant 16 : i32
    %96 = tpu.dynamic_rotate %67 by %c16_i32_44 dim 1 : vector<8x256xf32>, i32 -> vector<8x256xf32>
    %c7_45 = arith.constant 7 : index
    %c0_46 = arith.constant 0 : index
    %97 = vector.load %arg15[%c7_45, %c0_46] : memref<25x256xf32, #tpu.memory_space<vmem>>, vector<1x256xf32>
    %98 = vector.broadcast %97 : vector<1x256xf32> to vector<8x256xf32>
    %99 = arith.mulf %96, %98 : vector<8x256xf32>
    %c15_i32_47 = arith.constant 15 : i32
    %100 = tpu.dynamic_rotate %67 by %c15_i32_47 dim 1 : vector<8x256xf32>, i32 -> vector<8x256xf32>
    %c8_48 = arith.constant 8 : index
    %c0_49 = arith.constant 0 : index
    %101 = vector.load %arg15[%c8_48, %c0_49] : memref<25x256xf32, #tpu.memory_space<vmem>>, vector<1x256xf32>
    %102 = vector.broadcast %101 : vector<1x256xf32> to vector<8x256xf32>
    %103 = arith.mulf %100, %102 : vector<8x256xf32>
    %c14_i32 = arith.constant 14 : i32
    %104 = tpu.dynamic_rotate %67 by %c14_i32 dim 1 : vector<8x256xf32>, i32 -> vector<8x256xf32>
    %c9 = arith.constant 9 : index
    %c0_50 = arith.constant 0 : index
    %105 = vector.load %arg15[%c9, %c0_50] : memref<25x256xf32, #tpu.memory_space<vmem>>, vector<1x256xf32>
    %106 = vector.broadcast %105 : vector<1x256xf32> to vector<8x256xf32>
    %107 = arith.mulf %104, %106 : vector<8x256xf32>
    %c2_i32 = arith.constant 2 : i32
    %108 = tpu.dynamic_rotate %67 by %c2_i32 dim 1 : vector<8x256xf32>, i32 -> vector<8x256xf32>
    %c10 = arith.constant 10 : index
    %c0_51 = arith.constant 0 : index
    %109 = vector.load %arg15[%c10, %c0_51] : memref<25x256xf32, #tpu.memory_space<vmem>>, vector<1x256xf32>
    %110 = vector.broadcast %109 : vector<1x256xf32> to vector<8x256xf32>
    %111 = arith.mulf %108, %110 : vector<8x256xf32>
    %c1_i32_52 = arith.constant 1 : i32
    %112 = tpu.dynamic_rotate %67 by %c1_i32_52 dim 1 : vector<8x256xf32>, i32 -> vector<8x256xf32>
    %c11_53 = arith.constant 11 : index
    %c0_54 = arith.constant 0 : index
    %113 = vector.load %arg15[%c11_53, %c0_54] : memref<25x256xf32, #tpu.memory_space<vmem>>, vector<1x256xf32>
    %114 = vector.broadcast %113 : vector<1x256xf32> to vector<8x256xf32>
    %115 = arith.mulf %112, %114 : vector<8x256xf32>
    %c12_55 = arith.constant 12 : index
    %c0_56 = arith.constant 0 : index
    %116 = vector.load %arg15[%c12_55, %c0_56] : memref<25x256xf32, #tpu.memory_space<vmem>>, vector<1x256xf32>
    %117 = vector.broadcast %116 : vector<1x256xf32> to vector<8x256xf32>
    %118 = arith.mulf %67, %117 : vector<8x256xf32>
    %c255_i32_57 = arith.constant 255 : i32
    %119 = tpu.dynamic_rotate %67 by %c255_i32_57 dim 1 : vector<8x256xf32>, i32 -> vector<8x256xf32>
    %c13_58 = arith.constant 13 : index
    %c0_59 = arith.constant 0 : index
    %120 = vector.load %arg15[%c13_58, %c0_59] : memref<25x256xf32, #tpu.memory_space<vmem>>, vector<1x256xf32>
    %121 = vector.broadcast %120 : vector<1x256xf32> to vector<8x256xf32>
    %122 = arith.mulf %119, %121 : vector<8x256xf32>
    %c254_i32 = arith.constant 254 : i32
    %123 = tpu.dynamic_rotate %67 by %c254_i32 dim 1 : vector<8x256xf32>, i32 -> vector<8x256xf32>
    %c14 = arith.constant 14 : index
    %c0_60 = arith.constant 0 : index
    %124 = vector.load %arg15[%c14, %c0_60] : memref<25x256xf32, #tpu.memory_space<vmem>>, vector<1x256xf32>
    %125 = vector.broadcast %124 : vector<1x256xf32> to vector<8x256xf32>
    %126 = arith.mulf %123, %125 : vector<8x256xf32>
    %c242_i32 = arith.constant 242 : i32
    %127 = tpu.dynamic_rotate %67 by %c242_i32 dim 1 : vector<8x256xf32>, i32 -> vector<8x256xf32>
    %c15 = arith.constant 15 : index
    %c0_61 = arith.constant 0 : index
    %128 = vector.load %arg15[%c15, %c0_61] : memref<25x256xf32, #tpu.memory_space<vmem>>, vector<1x256xf32>
    %129 = vector.broadcast %128 : vector<1x256xf32> to vector<8x256xf32>
    %130 = arith.mulf %127, %129 : vector<8x256xf32>
    %c241_i32_62 = arith.constant 241 : i32
    %131 = tpu.dynamic_rotate %67 by %c241_i32_62 dim 1 : vector<8x256xf32>, i32 -> vector<8x256xf32>
    %c16_63 = arith.constant 16 : index
    %c0_64 = arith.constant 0 : index
    %132 = vector.load %arg15[%c16_63, %c0_64] : memref<25x256xf32, #tpu.memory_space<vmem>>, vector<1x256xf32>
    %133 = vector.broadcast %132 : vector<1x256xf32> to vector<8x256xf32>
    %134 = arith.mulf %131, %133 : vector<8x256xf32>
    %c240_i32_65 = arith.constant 240 : i32
    %135 = tpu.dynamic_rotate %67 by %c240_i32_65 dim 1 : vector<8x256xf32>, i32 -> vector<8x256xf32>
    %c17_66 = arith.constant 17 : index
    %c0_67 = arith.constant 0 : index
    %136 = vector.load %arg15[%c17_66, %c0_67] : memref<25x256xf32, #tpu.memory_space<vmem>>, vector<1x256xf32>
    %137 = vector.broadcast %136 : vector<1x256xf32> to vector<8x256xf32>
    %138 = arith.mulf %135, %137 : vector<8x256xf32>
    %c239_i32_68 = arith.constant 239 : i32
    %139 = tpu.dynamic_rotate %67 by %c239_i32_68 dim 1 : vector<8x256xf32>, i32 -> vector<8x256xf32>
    %c18_69 = arith.constant 18 : index
    %c0_70 = arith.constant 0 : index
    %140 = vector.load %arg15[%c18_69, %c0_70] : memref<25x256xf32, #tpu.memory_space<vmem>>, vector<1x256xf32>
    %141 = vector.broadcast %140 : vector<1x256xf32> to vector<8x256xf32>
    %142 = arith.mulf %139, %141 : vector<8x256xf32>
    %c238_i32 = arith.constant 238 : i32
    %143 = tpu.dynamic_rotate %67 by %c238_i32 dim 1 : vector<8x256xf32>, i32 -> vector<8x256xf32>
    %c19 = arith.constant 19 : index
    %c0_71 = arith.constant 0 : index
    %144 = vector.load %arg15[%c19, %c0_71] : memref<25x256xf32, #tpu.memory_space<vmem>>, vector<1x256xf32>
    %145 = vector.broadcast %144 : vector<1x256xf32> to vector<8x256xf32>
    %146 = arith.mulf %143, %145 : vector<8x256xf32>
    %c226_i32 = arith.constant 226 : i32
    %147 = tpu.dynamic_rotate %67 by %c226_i32 dim 1 : vector<8x256xf32>, i32 -> vector<8x256xf32>
    %c20 = arith.constant 20 : index
    %c0_72 = arith.constant 0 : index
    %148 = vector.load %arg15[%c20, %c0_72] : memref<25x256xf32, #tpu.memory_space<vmem>>, vector<1x256xf32>
    %149 = vector.broadcast %148 : vector<1x256xf32> to vector<8x256xf32>
    %150 = arith.mulf %147, %149 : vector<8x256xf32>
    %c225_i32 = arith.constant 225 : i32
    %151 = tpu.dynamic_rotate %67 by %c225_i32 dim 1 : vector<8x256xf32>, i32 -> vector<8x256xf32>
    %c21 = arith.constant 21 : index
    %c0_73 = arith.constant 0 : index
    %152 = vector.load %arg15[%c21, %c0_73] : memref<25x256xf32, #tpu.memory_space<vmem>>, vector<1x256xf32>
    %153 = vector.broadcast %152 : vector<1x256xf32> to vector<8x256xf32>
    %154 = arith.mulf %151, %153 : vector<8x256xf32>
    %c224_i32 = arith.constant 224 : i32
    %155 = tpu.dynamic_rotate %67 by %c224_i32 dim 1 : vector<8x256xf32>, i32 -> vector<8x256xf32>
    %c22 = arith.constant 22 : index
    %c0_74 = arith.constant 0 : index
    %156 = vector.load %arg15[%c22, %c0_74] : memref<25x256xf32, #tpu.memory_space<vmem>>, vector<1x256xf32>
    %157 = vector.broadcast %156 : vector<1x256xf32> to vector<8x256xf32>
    %158 = arith.mulf %155, %157 : vector<8x256xf32>
    %c223_i32 = arith.constant 223 : i32
    %159 = tpu.dynamic_rotate %67 by %c223_i32 dim 1 : vector<8x256xf32>, i32 -> vector<8x256xf32>
    %c23 = arith.constant 23 : index
    %c0_75 = arith.constant 0 : index
    %160 = vector.load %arg15[%c23, %c0_75] : memref<25x256xf32, #tpu.memory_space<vmem>>, vector<1x256xf32>
    %161 = vector.broadcast %160 : vector<1x256xf32> to vector<8x256xf32>
    %162 = arith.mulf %159, %161 : vector<8x256xf32>
    %c222_i32 = arith.constant 222 : i32
    %163 = tpu.dynamic_rotate %67 by %c222_i32 dim 1 : vector<8x256xf32>, i32 -> vector<8x256xf32>
    %c24 = arith.constant 24 : index
    %c0_76 = arith.constant 0 : index
    %164 = vector.load %arg15[%c24, %c0_76] : memref<25x256xf32, #tpu.memory_space<vmem>>, vector<1x256xf32>
    %165 = vector.broadcast %164 : vector<1x256xf32> to vector<8x256xf32>
    %166 = arith.mulf %163, %165 : vector<8x256xf32>
    %167 = tpu.concatenate %71, %75, %79, %83, %87, %91, %95, %99, %103, %107, %111, %115, %118, %122, %126, %130 in 0 : vector<8x256xf32>, vector<8x256xf32>, vector<8x256xf32>, vector<8x256xf32>, vector<8x256xf32>, vector<8x256xf32>, vector<8x256xf32>, vector<8x256xf32>, vector<8x256xf32>, vector<8x256xf32>, vector<8x256xf32>, vector<8x256xf32>, vector<8x256xf32>, vector<8x256xf32>, vector<8x256xf32>, vector<8x256xf32> -> vector<128x256xf32>
    %168 = tpu.concatenate %134, %138, %142, %146, %150, %154, %158, %162, %166 in 0 : vector<8x256xf32>, vector<8x256xf32>, vector<8x256xf32>, vector<8x256xf32>, vector<8x256xf32>, vector<8x256xf32>, vector<8x256xf32>, vector<8x256xf32>, vector<8x256xf32> -> vector<72x256xf32>
    %169 = tpu.concatenate %167, %168 in 0 : vector<128x256xf32>, vector<72x256xf32> -> vector<200x256xf32>
    %c0_77 = arith.constant 0 : index
    %c0_78 = arith.constant 0 : index
    %170 = vector.load %arg10[%c0_77, %c0_78] : memref<8x200xf32, #tpu.memory_space<vmem>>, vector<8x200xf32>
    %cst_79 = arith.constant dense<0.000000e+00> : vector<8x256xf32>
    %171 = tpu.matmul %170, %169, %cst_79 {dimension_numbers = #tpu.dot_dimension_numbers<[1], [0], [0], [1], [0, 0, 1, 1], [], []>} : vector<8x200xf32>, vector<200x256xf32>, vector<8x256xf32> -> vector<8x256xf32>
    %c0_80 = arith.constant 0 : index
    %c0_81 = arith.constant 0 : index
    %172 = vector.load %arg11[%c0_80, %c0_81] : memref<8x1xf32, #tpu.memory_space<vmem>>, vector<8x1xf32>
    %173 = vector.broadcast %172 : vector<8x1xf32> to vector<8x256xf32>
    %174 = arith.addf %171, %173 : vector<8x256xf32>
    %cst_82 = arith.constant 0.000000e+00 : f32
    %175 = vector.broadcast %cst_82 : f32 to vector<8x256xf32>
    %176 = arith.cmpf oge, %174, %175 : vector<8x256xf32>
    %cst_83 = arith.constant 0.00999999977 : f32
    %177 = vector.broadcast %cst_83 : f32 to vector<8x256xf32>
    %178 = arith.mulf %177, %174 : vector<8x256xf32>
    %179 = arith.select %176, %174, %178 : vector<8x256xi1>, vector<8x256xf32>
    %c255_i32_84 = arith.constant 255 : i32
    %180 = tpu.dynamic_rotate %1 by %c255_i32_84 dim 1 : vector<4x256xf32>, i32 -> vector<4x256xf32>
    %181 = arith.maximumf %1, %180 : vector<4x256xf32>
    %c240_i32_85 = arith.constant 240 : i32
    %182 = tpu.dynamic_rotate %1 by %c240_i32_85 dim 1 : vector<4x256xf32>, i32 -> vector<4x256xf32>
    %c239_i32_86 = arith.constant 239 : i32
    %183 = tpu.dynamic_rotate %1 by %c239_i32_86 dim 1 : vector<4x256xf32>, i32 -> vector<4x256xf32>
    %184 = arith.maximumf %182, %183 : vector<4x256xf32>
    %185 = arith.maximumf %181, %184 : vector<4x256xf32>
    %c0_87 = arith.constant 0 : index
    %c0_88 = arith.constant 0 : index
    %186 = vector.load %arg12[%c0_87, %c0_88] : memref<8x4xf32, #tpu.memory_space<vmem>>, vector<8x4xf32>
    %cst_89 = arith.constant dense<0.000000e+00> : vector<8x256xf32>
    %187 = tpu.matmul %186, %185, %cst_89 {dimension_numbers = #tpu.dot_dimension_numbers<[1], [0], [0], [1], [0, 0, 1, 1], [], []>} : vector<8x4xf32>, vector<4x256xf32>, vector<8x256xf32> -> vector<8x256xf32>
    %c0_90 = arith.constant 0 : index
    %c0_91 = arith.constant 0 : index
    %188 = vector.load %arg14[%c0_90, %c0_91] : memref<256x256xf32, #tpu.memory_space<vmem>>, vector<256x256xf32>
    %cst_92 = arith.constant dense<0.000000e+00> : vector<8x256xf32>
    %189 = tpu.matmul %187, %188, %cst_92 {dimension_numbers = #tpu.dot_dimension_numbers<[1], [0], [0], [1], [0, 0, 1, 1], [], []>} : vector<8x256xf32>, vector<256x256xf32>, vector<8x256xf32> -> vector<8x256xf32>
    %c0_93 = arith.constant 0 : index
    %c0_94 = arith.constant 0 : index
    %190 = vector.load %arg13[%c0_93, %c0_94] : memref<8x1xf32, #tpu.memory_space<vmem>>, vector<8x1xf32>
    %191 = vector.broadcast %190 : vector<8x1xf32> to vector<8x256xf32>
    %192 = arith.addf %189, %191 : vector<8x256xf32>
    %cst_95 = arith.constant 0.000000e+00 : f32
    %193 = vector.broadcast %cst_95 : f32 to vector<8x256xf32>
    %194 = arith.cmpf oge, %192, %193 : vector<8x256xf32>
    %cst_96 = arith.constant 0.00999999977 : f32
    %195 = vector.broadcast %cst_96 : f32 to vector<8x256xf32>
    %196 = arith.mulf %195, %192 : vector<8x256xf32>
    %197 = arith.select %194, %192, %196 : vector<8x256xi1>, vector<8x256xf32>
    %c0_97 = arith.constant 0 : index
    %c0_98 = arith.constant 0 : index
    %c0_99 = arith.constant 0 : index
    %198 = vector.load %arg16[%c0_97, %c0_98, %c0_99] : memref<1x32x256xf32, #tpu.memory_space<vmem>>, vector<1x8x256xf32>
    %199 = vector.shape_cast %198 : vector<1x8x256xf32> to vector<8x256xf32>
    %200 = vector.shape_cast %11 : vector<8x256xf32> to vector<1x8x256xf32>
    tpu.vector_store %arg16[%c0_97, %c0_98, %c0_99], %200 {strides = array<i32>} : memref<1x32x256xf32, #tpu.memory_space<vmem>>, vector<1x8x256xf32>,
    %c0_100 = arith.constant 0 : index
    %c8_101 = arith.constant 8 : index
    %c0_102 = arith.constant 0 : index
    %201 = vector.load %arg16[%c0_100, %c8_101, %c0_102] : memref<1x32x256xf32, #tpu.memory_space<vmem>>, vector<1x8x256xf32>
    %202 = vector.shape_cast %201 : vector<1x8x256xf32> to vector<8x256xf32>
    %203 = vector.shape_cast %62 : vector<8x256xf32> to vector<1x8x256xf32>
    tpu.vector_store %arg16[%c0_100, %c8_101, %c0_102], %203 {strides = array<i32>} : memref<1x32x256xf32, #tpu.memory_space<vmem>>, vector<1x8x256xf32>,
    %c0_103 = arith.constant 0 : index
    %c16_104 = arith.constant 16 : index
    %c0_105 = arith.constant 0 : index
    %204 = vector.load %arg16[%c0_103, %c16_104, %c0_105] : memref<1x32x256xf32, #tpu.memory_space<vmem>>, vector<1x8x256xf32>
    %205 = vector.shape_cast %204 : vector<1x8x256xf32> to vector<8x256xf32>
    %206 = vector.shape_cast %179 : vector<8x256xf32> to vector<1x8x256xf32>
    tpu.vector_store %arg16[%c0_103, %c16_104, %c0_105], %206 {strides = array<i32>} : memref<1x32x256xf32, #tpu.memory_space<vmem>>, vector<1x8x256xf32>,
    %c0_106 = arith.constant 0 : index
    %c24_107 = arith.constant 24 : index
    %c0_108 = arith.constant 0 : index
    %207 = vector.load %arg16[%c0_106, %c24_107, %c0_108] : memref<1x32x256xf32, #tpu.memory_space<vmem>>, vector<1x8x256xf32>
    %208 = vector.shape_cast %207 : vector<1x8x256xf32> to vector<8x256xf32>
    %209 = vector.shape_cast %197 : vector<8x256xf32> to vector<1x8x256xf32>
    tpu.vector_store %arg16[%c0_106, %c24_107, %c0_108], %209 {strides = array<i32>} : memref<1x32x256xf32, #tpu.memory_space<vmem>>, vector<1x8x256xf32>,
    return
  }
  func.func @transform_0(%arg0: i32) -> (i32, i32, i32) {
    %c0_i32 = arith.constant 0 : i32
    %c0_i32_0 = arith.constant 0 : i32
    %c0_i32_1 = arith.constant 0 : i32
    return %arg0, %c0_i32, %c0_i32_0 : i32, i32, i32
  }
  func.func @transform_1(%arg0: i32) -> (i32, i32) {
    %c0_i32 = arith.constant 0 : i32
    %c0_i32_0 = arith.constant 0 : i32
    %c0_i32_1 = arith.constant 0 : i32
    return %c0_i32, %c0_i32_0 : i32, i32
  }
  func.func @transform_2(%arg0: i32) -> (i32, i32) {
    %c0_i32 = arith.constant 0 : i32
    %c0_i32_0 = arith.constant 0 : i32
    %c0_i32_1 = arith.constant 0 : i32
    return %c0_i32, %c0_i32_0 : i32, i32
  }
  func.func @transform_3(%arg0: i32) -> (i32, i32) {
    %c0_i32 = arith.constant 0 : i32
    %c0_i32_0 = arith.constant 0 : i32
    %c0_i32_1 = arith.constant 0 : i32
    return %c0_i32, %c0_i32_0 : i32, i32
  }
  func.func @transform_4(%arg0: i32) -> (i32, i32) {
    %c0_i32 = arith.constant 0 : i32
    %c0_i32_0 = arith.constant 0 : i32
    %c0_i32_1 = arith.constant 0 : i32
    return %c0_i32, %c0_i32_0 : i32, i32
  }
  func.func @transform_5(%arg0: i32) -> (i32, i32) {
    %c0_i32 = arith.constant 0 : i32
    %c0_i32_0 = arith.constant 0 : i32
    %c0_i32_1 = arith.constant 0 : i32
    return %c0_i32, %c0_i32_0 : i32, i32
  }
  func.func @transform_6(%arg0: i32) -> (i32, i32) {
    %c0_i32 = arith.constant 0 : i32
    %c0_i32_0 = arith.constant 0 : i32
    %c0_i32_1 = arith.constant 0 : i32
    return %c0_i32, %c0_i32_0 : i32, i32
  }
  func.func @transform_7(%arg0: i32) -> (i32, i32) {
    %c0_i32 = arith.constant 0 : i32
    %c0_i32_0 = arith.constant 0 : i32
    %c0_i32_1 = arith.constant 0 : i32
    return %c0_i32, %c0_i32_0 : i32, i32
  }
  func.func @transform_8(%arg0: i32) -> (i32, i32) {
    %c0_i32 = arith.constant 0 : i32
    %c0_i32_0 = arith.constant 0 : i32
    %c0_i32_1 = arith.constant 0 : i32
    return %c0_i32, %c0_i32_0 : i32, i32
  }
  func.func @transform_9(%arg0: i32) -> (i32, i32) {
    %c0_i32 = arith.constant 0 : i32
    %c0_i32_0 = arith.constant 0 : i32
    %c0_i32_1 = arith.constant 0 : i32
    return %c0_i32, %c0_i32_0 : i32, i32
  }
  func.func @transform_10(%arg0: i32) -> (i32, i32) {
    %c0_i32 = arith.constant 0 : i32
    %c0_i32_0 = arith.constant 0 : i32
    %c0_i32_1 = arith.constant 0 : i32
    return %c0_i32, %c0_i32_0 : i32, i32
  }
  func.func @transform_11(%arg0: i32) -> (i32, i32) {
    %c0_i32 = arith.constant 0 : i32
    %c0_i32_0 = arith.constant 0 : i32
    %c0_i32_1 = arith.constant 0 : i32
    return %c0_i32, %c0_i32_0 : i32, i32
  }
  func.func @transform_12(%arg0: i32) -> (i32, i32) {
    %c0_i32 = arith.constant 0 : i32
    %c0_i32_0 = arith.constant 0 : i32
    %c0_i32_1 = arith.constant 0 : i32
    return %c0_i32, %c0_i32_0 : i32, i32
  }
  func.func @transform_13(%arg0: i32) -> (i32, i32) {
    %c0_i32 = arith.constant 0 : i32
    %c0_i32_0 = arith.constant 0 : i32
    %c0_i32_1 = arith.constant 0 : i32
    return %c0_i32, %c0_i32_0 : i32, i32
  }
  func.func @transform_14(%arg0: i32) -> (i32, i32) {
    %c0_i32 = arith.constant 0 : i32
    %c0_i32_0 = arith.constant 0 : i32
    %c0_i32_1 = arith.constant 0 : i32
    return %c0_i32, %c0_i32_0 : i32, i32
  }
  func.func @transform_15(%arg0: i32) -> (i32, i32, i32) {
    %c0_i32 = arith.constant 0 : i32
    %c0_i32_0 = arith.constant 0 : i32
    %c0_i32_1 = arith.constant 0 : i32
    return %arg0, %c0_i32, %c0_i32_0 : i32, i32, i32
  }
}

</mosaic_0001>

<bundles_post_ra>
// kernel: tpu_custom_call.1
= control target key start
LH: loop header
LB: loop body
LE: loop exit
PB: predicated region body
PF: predicated region fallthrough
CT: control target
= control target key end

     0   :  { %20 = vsyncpa [#allocation3], 0  ;;  %s3038_s0 = inlined_call_operand.vmem [shape: f32[2,4,256], index: 0, kind: input, shape index: {}]   ;;  %s3039_s1 = inlined_call_operand.vmem [shape: f32[8,4], index: 1, kind: input, shape index: {}]   ;;  %s3040_s2 = inlined_call_operand.vmem [shape: f32[8,1], index: 2, kind: input, shape index: {}]   ;;  %s3041_s3 = inlined_call_operand.vmem [shape: f32[8,4], index: 3, kind: input, shape index: {}]   ;;  %s3042_s4 = inlined_call_operand.vmem [shape: f32[8,1], index: 4, kind: input, shape index: {}]   ;;  %s3043_s5 = inlined_call_operand.vmem [shape: f32[8,72], index: 5, kind: input, shape index: {}]   ;;  %s3044_s6 = inlined_call_operand.vmem [shape: f32[8,1], index: 6, kind: input, shape index: {}]   ;;  %s3045_s7 = inlined_call_operand.vmem [shape: f32[8,4], index: 7, kind: input, shape index: {}]   ;;  %s3046_s8 = inlined_call_operand.vmem [shape: f32[8,1], index: 8, kind: input, shape index: {}]   ;;  %s3047_s9 = inlined_call_operand.vmem [shape: f32[8,200], index: 9, kind: input, shape index: {}]   ;;  %s3048_s10 = inlined_call_operand.vmem [shape: f32[8,1], index: 10, kind: input, shape index: {}]   ;;  %s3049_s11 = inlined_call_operand.vmem [shape: f32[8,4], index: 11, kind: input, shape index: {}]   ;;  %s3050_s12 = inlined_call_operand.vmem [shape: f32[8,1], index: 12, kind: input, shape index: {}]   ;;  %s3051_s13 = inlined_call_operand.hbm [shape: f32[256,256], index: 13, kind: input, shape index: {}]   ;;  %s3052_s14 = inlined_call_operand.vmem [shape: f32[25,256], index: 14, kind: input, shape index: {}]   ;;  %s3053_s15 = inlined_call_operand.hbm [shape: f32[2,32,256], index: 15, kind: output, shape index: {}]  }
   0x1   :  { %21 = vsyncpa [#allocation4], 0 }
   0x2   :  { %23 = vsyncpa [#allocation4 + $0x1], 0  ;;  %s2378_s18 = smov 0   ;;  %s2380_s19 = smov 0  }
   0x3   :  { %s2382_s20 = smov 0   ;;  %s2384_s21 = smov 0  }
   0x4 LB: > { %3068 = sst [smem:[#allocation8_spill]] %s2253_s18  ;;  %s2399_s22 = sadd.s32 4294967295, %s2265_s21   ;;  %s2265_s21 = sphi %s2384_s21, %s3087_s21   ;;  %s2261_s20 = sphi %s2382_s20, %s3089_s20   ;;  %s2257_s19 = sphi %s2380_s19, %s3091_s19   ;;  %s2253_s18 = sphi %s2378_s18, %s3090_s18  }
   0x5   : > { %3069 = sst [smem:[#allocation9_spill]] %s2261_s20  ;;  %s1907_s23 = sadd.s32 4294967294, %s2265_s21  }
   0x6   : > { %s2403_s24 = sadd.s32 1, %s2265_s21   ;;  %s356_s25 = sadd.s32 1, %s2261_s20 }
   0x7   : > { %3070 = sst [smem:[#allocation10_spill]] %s2403_s24  ;;  %s353_s26 = ssub.s32 %s2265_s21, %s2403_s24 }
   0x8   : > { %p366_p0 = scmp.ne.s32.totalorder %s2261_s20, %s2257_s19  ;;  %p354_p1 = scmp.eq.s32.totalorder %s353_s26, 0 }
   0x9   : > { %p367_p2 = scmp.eq.s32.totalorder %s2399_s22, 1  ;;  %p372_p3 = scmp.ne.s32.totalorder %s2257_s19, %s2253_s18 }
   0xa   : > { %p373_p4 = scmp.eq.s32.totalorder %s1907_s23, 1  ;;  %p1908_p7 = scmp.ge.s32.totalorder %s2265_s21, 1 }
   0xb   : > { %s2414_s27 = scalar_select %p354_p1, %s2261_s20, %s356_s25  }
   0xc   : > { %p2416_p5 = por %p367_p2, %p366_p0  ;;  %p2420_p6 = por %p373_p4, %p372_p3 }
   0xd   : > { %3071 = sst [smem:[#allocation11_spill]] %s2414_s27  ;;  %p380_p8 = scmp.lt.s32.totalorder %s2265_s21, 3 }
   0xe   : > { %s3072_s28 = scalar_select %p2416_p5, 1, 0 }
   0xf   : > { %s3073_s29 = scalar_select %p2420_p6, 1, 0 }
  0x10   : > { %p3059_p9 = scmp.eq.s32.totalorder %s2399_s22, 0  ;;  %p2427_p10 = pnand %p1908_p7, %p380_p8 }
  0x11   : > { %3074 = sst [smem:[#allocation12_spill]] %s3073_s29  ;;  %s2267_s16 = smov [#allocation2]  }
  0x12   : > { %s3075_s30 = scalar_select %p2427_p10, 1, 0 }
  0x13   : > { %s428_s17 = sshll.u32 %s2267_s16, 4  ;;  %p2095_p11 = pneg %p2427_p10  ;;  %s429_s17 = int_to_ptr.vmem [resolvable:$true] %s428_s17 }
  0x14   : > { %s2171_s27 = scalar_lea.hbm %s3051_s13, 8192 }
  0x15   : > { %p2435_p12 = pnand %p3059_p9, %p2095_p11  ;;  %p2172_p13 = scmp.ne.s32.totalorder %s3051_s13, %s2171_s27 }
  0x16   : > { %p2178_p3 = scmp.lt.u32.totalorder %s2171_s27, %s3051_s13 }
  0x17   : > { %p2173_p0 = pneg %p2435_p12 }
  0x19   : > { %p2174_p1 = pnand %p2173_p0, %p2172_p13 }
  0x1b   : > { %p2175_p2 = pneg %p2174_p1 }
  0x1d   : > { %p2180_p4 = pnand %p2178_p3, %p2175_p2 }
  0x1f   : > { %2183 = shalt.err (!%p2180_p4)
}
  0x20   : > { %s2184_s18 = scalar_lea.vmem %s429_s17, 8192  ;;  %p2192_p9 = scmp.lt.s32.totalorder %s429_s17, %s429_s17 }
  0x21   : > { %p2185_p7 = scmp.ne.s32.totalorder %s429_s17, %s2184_s18  ;;  %p2193_p6 = scmp.lt.s32.totalorder %s2184_s18, %s2184_s18 }
  0x23   : > { %p2187_p8 = pnand %p2185_p7, %p2173_p0  ;;  %p2194_p5 = por %p2193_p6, %p2192_p9 }
  0x25   : > { %p2188_p11 = pneg %p2187_p8 }
  0x27   : > { %p2195_p10 = pnand %p2194_p5, %p2188_p11 }
  0x29   : > { %2198 = shalt.err (!%p2195_p10)
}
  0x2a   : > { %s2268_s20 = smov 256   ;;  %s2269_s24 = smov 16  }
  0x2b   : > { %2098 = dma.hbm_to_vmem [thread:$0]  (!%p2435_p12), %s3051_s13, 8192, %s429_s17, [#allocation3], %s2268_s20, %s2268_s20, %s2269_s24  }
  0x2c   : > { %p3077_p13 = scmp.ne.s32.totalorder %s3075_s30, 0 }
  0x2d   : > { %p3078_p1 = scmp.eq.s32.totalorder (!%p3077_p13), %s2399_s22, 0 }
  0x2e   : > { %455 = sbr.rel (%p3077_p13) target bundleno = 1095 (0x447), region = 80 }
  0x35   : > { %2244 = dma.done.wait (%p3078_p1), [#allocation3], 8192   ;;  %p3079_p0 = pmov %p3078_p1 }
  0x36   : > { %p503_p5 = scmp.lt.s32.totalorder %s2399_s22, 1  ;;  %v2270_v0 = vmov 0.0   ;;  %v2271_v1 = vmov 0   ;;  %vm522_vm0 = vcmask 1043456   ;;  %v605_v3 = vld [vmem:[%s3042_s4] sm:$0xff]  ;;  %vm518_vm1 = vcmask 31744  }
  0x37   : > { %2246 = vsyncadd (%p3079_p0), [#allocation3], 4294959104  ;;  %678 = vmatprep.mubr.f32.mxu1 %v2270_v0  ;;  %591 = vmatprep.mubr.f32.mxu0 %v2270_v0  ;;  %v604_v5 = vld [vmem:[%s3041_s3] sm:$0xff]  ;;  %s2272_s25 = smov 16   ;;  %s2273_s26 = smov 17   ;;  %v689_v13 = vlaneseq  ;;  %vm885_vm10 = vcmask 588800  }
  0x38   : > { %s504_s18 = scalar_select %p503_p5, %s2399_s22, 1  ;;  %2168 = vset.pattern.permute.xlu0 %v2271_v1  ;;  %2169 = vset.pattern.permute.xlu1 %v2271_v1  ;;  %v509_v11 = vld [vmem:[%s3039_s1] sm:$0xff]  ;;  %v1925_v24 = vld [vmem:[%s3052_s14 + $0x13] ss:$8 sm:$0x3] }
  0x39   : > { %608 = vperm.xlu0 %2168, %v605_v3   ;;  %s2276_s29 = smov 127   ;;  %s3062_s30 = smov 113   ;;  %v967_v12 = vld [vmem:[%s3046_s8] sm:$0xff]  ;;  %v2546_v16 = vand.u32 127, %v689_v13  ;;  %v698_v17 = vshrl.u32 %v689_v13, 7 }
  0x3a   : > { %s1959_s27 = sshll.u32 %s504_s18, 3  ;;  %s2274_s18 = smov 15   ;;  %v1923_v20 = vld [vmem:[%s3052_s14 + $0x7] ss:$8 sm:$0x3] }
  0x3b   : > { %s507_s17 = scalar_lea.vmem %s3038_s0, %s1959_s27  ;;  %s2275_s27 = smov 1   ;;  %v2551_v21 = vsub.s32 0, %v698_v17  ;;  %v2553_v22 = vsub.s32 1, %v698_v17  ;;  %vm713_vm2 = vcmp.lt.s32.totalorder %v2546_v16, 16  ;;  %vm735_vm3 = vcmp.lt.s32.totalorder %v2546_v16, 15 }
  0x3c   : > { %v2468_v2 = vld [vmem:[%s507_s17] sm:$0xff]  ;;  %s3066_s17 = smov 112   ;;  %s3064_s23 = smov 111   ;;  %v1924_v28 = vld [vmem:[%s3052_s14 + $0x10] ss:$8 sm:$0x3] }
  0x3d   : > { %v2475_v4 = vcombine.high %v2468_v2, %v2468_v2  ;;  %v1922_v23 = vld [vmem:[%s3052_s14 + $0x6] ss:$8 sm:$0x3]  ;;  %v2563_v25 = vrot.slane %v1923_v20, %v2551_v21  ;;  %v2566_v26 = vrot.slane %v1923_v20, %v2553_v22  ;;  %vm691_vm4 = vcmp.lt.s32.totalorder %v2546_v16, 17  ;;  %s2280_s16 = smov 34   ;;  %s2281_s20 = smov 33  }
  0x3e   : > { %v1927_v32 = vld [vmem:[%s3052_s14 + $0x15] ss:$8 sm:$0x3]  ;;  %v2581_v33 = vrot.slane %v1922_v23, %v2551_v21  ;;  %v2584_v34 = vrot.slane %v1922_v23, %v2553_v22  ;;  %vm757_vm5 = vcmp.lt.s32.totalorder %v2546_v16, 1  ;;  %v2588_v35 = vrot.slane %v1925_v24, %v2553_v22  ;;  %s2285_s24 = smov 18   ;;  %p3083_p9 = scmp.ne.s32.totalorder %s3072_s28, 0 }
  0x3f   : > { %1919 = vmatprep.subr.msk.mxu1 %vm522_vm0, %v2475_v4  ;;  %1916 = vmatprep.subr.msk.mxu0 %vm522_vm0, %v2475_v4  ;;  %v2591_v36 = vrot.slane %v1924_v28, %v2553_v22  ;;  %v2594_v37 = vrot.slane %v1925_v24, %v2551_v21  ;;  %v1926_v42 = vld [vmem:[%s3052_s14 + $0x14] ss:$8 sm:$0x3]  ;;  %vm794_vm6 = vcmp.lt.s32.totalorder %v2546_v16, 127  ;;  %v2603_v43 = vrot.slane %v1927_v32, %v2553_v22 }
  0x40   : > { %1920 = vmatpush1.msk.msra.mxu1 %vm522_vm0, %v2468_v2  ;;  %1917 = vmatpush1.msk.msra.mxu0 %vm522_vm0, %v2468_v2  ;;  %v2619_v52 = vrot.slane %v1924_v28, %v2551_v21  ;;  %v2622_v53 = vrot.slane %v1926_v42, %v2553_v22  ;;  %v2629_v61 = vrot.slane %v1927_v32, %v2551_v21  ;;  %vm816_vm7 = vcmp.lt.s32.totalorder %v2546_v16, 113 }
  0x41   : > { %1921 = vmatmul.mubr.msk.f32.vlgmr.msra.gmra.mrb[0].mxu1 %vm518_vm1, %v604_v5  ;;  %1918 = vmatmul.mubr.msk.f32.vlgmr.msra.gmra.mrb[0].mxu0 %vm518_vm1, %v509_v11  ;;  %v1928_v5 = vld [vmem:[%s3052_s14 + $0x20] ss:$8 sm:$0x3]  ;;  %vm838_vm8 = vcmp.lt.s32.totalorder %v2546_v16, 112  ;;  %vm860_vm9 = vcmp.lt.s32.totalorder %v2546_v16, 111  ;;  %vm1051_vm11 = vcmp.lt.s32.totalorder %v2546_v16, 34 }
  0x42   : > { %953 = vmatprep.mubr.f32.mxu1 %v2270_v0  ;;  %1657 = vmatprep.mubr.f32.mxu0 %v2270_v0  ;;  %v2651_v17 = vrot.slane %v1928_v5, %v2551_v21  ;;  %vm1072_vm12 = vcmp.lt.s32.totalorder %v2546_v16, 33  ;;  %vm1094_vm13 = vcmp.lt.s32.totalorder %v2546_v16, 32  ;;  %vm1116_vm14 = vcmp.lt.s32.totalorder %v2546_v16, 31 }
  0x43   : > { %vm1138_vm15 = vcmp.lt.s32.totalorder %v2546_v16, 30 }
  0xb8   : > { %v609_v6 = vpop.permute.xlu0 %608 }
 0x114   : > { %v680_v7 = vpop.f32.mrb[0].mxu1 }
 0x115   : > { %v2490_v8 = vadd.f32 %v680_v7, %v609_v6  ;;  %v682_v9 = vpop.f32.mrb[1].mxu1  ;;  %v2641_v7 = vrot.slane %v1926_v42, %v2551_v21 }
 0x116   : > { %v2496_v10 = vadd.f32 %v682_v9, %v609_v6  ;;  %v1929_v9 = vld [vmem:[%s3052_s14 + $0x21] ss:$8 sm:$0x3] }
 0x117   : > { %709 = vrot.lane.b32.xlu1 %v2490_v8, %s2272_s25  ;;  %685 = vrot.lane.b32.xlu0 %v2490_v8, %s2273_s26  ;;  %v2658_v20 = vrot.slane %v1929_v9, %v2551_v21  ;;  %v2661_v23 = vrot.slane %v1929_v9, %v2553_v22  ;;  %v788_v24 = vmul.f32 %v2641_v7, %v2490_v8 }
 0x118   : > { %v789_v13 = vmul.f32 %v2622_v53, %v2496_v10 }
 0x11b   : > { %731 = vrot.lane.b32.xlu1 %v2490_v8, %s2274_s18  ;;  %711 = vrot.lane.b32.xlu0 %v2496_v10, %s2272_s25 }
 0x11f   : > { %753 = vrot.lane.b32.xlu1 %v2490_v8, %s2275_s27  ;;  %733 = vrot.lane.b32.xlu0 %v2496_v10, %s2274_s18 }
 0x123   : > { %687 = vrot.lane.b32.xlu1 %v2496_v10, %s2273_s26  ;;  %755 = vrot.lane.b32.xlu0 %v2496_v10, %s2275_s27 }
 0x127   : > { %790 = vrot.lane.b32.xlu1 %v2490_v8, %s2276_s29  ;;  %792 = vrot.lane.b32.xlu0 %v2496_v10, %s2276_s29 }
 0x12b   : > { %812 = vrot.lane.b32.xlu1 %v2490_v8, %s3062_s30  ;;  %814 = vrot.lane.b32.xlu0 %v2496_v10, %s3062_s30  ;;  %s2284_s30 = smov 30  }
 0x12f   : > { %834 = vrot.lane.b32.xlu1 %v2490_v8, %s3066_s17  ;;  %836 = vrot.lane.b32.xlu0 %v2496_v10, %s3066_s17 }
 0x133   : > { %856 = vrot.lane.b32.xlu1 %v2490_v8, %s3064_s23  ;;  %858 = vrot.lane.b32.xlu0 %v2496_v10, %s3064_s23  ;;  %v1930_v10 = vld [vmem:[%s3052_s14 + $0x22] ss:$8 sm:$0x3] }
 0x134   : > { %v2678_v8 = vrot.slane %v1930_v10, %v2553_v22 }
 0x137   : > { %1553 = vrot.lane.b32.xlu1 %v2468_v2, %s2276_s29  ;;  %1555 = vrot.lane.b32.xlu0 %v2475_v4, %s2276_s29 }
 0x13b   : > { %1564 = vrot.lane.b32.xlu1 %v2468_v2, %s3066_s17  ;;  %1566 = vrot.lane.b32.xlu0 %v2475_v4, %s3066_s17  ;;  %s2282_s17 = smov 32  }
 0x13f   : > { %1570 = vrot.lane.b32.xlu1 %v2468_v2, %s3064_s23  ;;  %1572 = vrot.lane.b32.xlu0 %v2475_v4, %s3064_s23  ;;  %s2283_s23 = smov 31  }
 0x143   : > { %970 = vperm.xlu1 %2169, %v967_v12  }
 0x189   : > { %v710_v14 = vpop.permute.xlu1 %709  ;;  %v686_v15 = vpop.permute.xlu0 %685 }
 0x18d   : > { %v732_v18 = vpop.permute.xlu1 %731  ;;  %v712_v19 = vpop.permute.xlu0 %711 }
 0x18e   : > { %v714_v30 = vsel %vm713_vm2, %v710_v14, %v712_v19  ;;  %v715_v31 = vsel %vm713_vm2, %v712_v19, %v710_v14 }
 0x18f   : > { %v729_v38 = vmul.f32 %v2563_v25, %v715_v31  ;;  %v730_v39 = vmul.f32 %v2566_v26, %v714_v30 }
 0x191   : > { %v754_v27 = vpop.permute.xlu1 %753  ;;  %v734_v29 = vpop.permute.xlu0 %733 }
 0x192   : > { %v736_v44 = vsel %vm735_vm3, %v732_v18, %v734_v29  ;;  %v737_v54 = vsel %vm735_vm3, %v734_v29, %v732_v18  ;;  %v2654_v18 = vrot.slane %v1928_v5, %v2553_v22 }
 0x193   : > { %v752_v55 = vmul.f32 %v2591_v36, %v736_v44  ;;  %v751_v6 = vmul.f32 %v2619_v52, %v737_v54 }
 0x195   : > { %v688_v40 = vpop.permute.xlu1 %687  ;;  %v756_v41 = vpop.permute.xlu0 %755 }
 0x196   : > { %v692_v45 = vsel %vm691_vm4, %v686_v15, %v688_v40  ;;  %v693_v46 = vsel %vm691_vm4, %v688_v40, %v686_v15  ;;  %v758_v47 = vsel %vm757_vm5, %v754_v27, %v756_v41  ;;  %v759_v50 = vsel %vm757_vm5, %v756_v41, %v754_v27 }
 0x197   : > { %v707_v48 = vmul.f32 %v2581_v33, %v693_v46  ;;  %v708_v49 = vmul.f32 %v2584_v34, %v692_v45  ;;  %v774_v51 = vmul.f32 %v2588_v35, %v758_v47  ;;  %v773_v60 = vmul.f32 %v2594_v37, %v759_v50 }
 0x199   : > { %v1963_v56 = vpack.c.bf16 %v729_v38, %v707_v48  ;;  %v791_v57 = vpop.permute.xlu1 %790  ;;  %v793_v58 = vpop.permute.xlu0 %792  ;;  %v1961_v59 = vpack.c.bf16 %v730_v39, %v708_v49  ;;  %v1965_v3 = vpack.c.bf16 %v774_v51, %v752_v55  ;;  %v1967_v14 = vpack.c.bf16 %v773_v60, %v751_v6 }
 0x19a   : > { %v796_v62 = vsel %vm794_vm6, %v793_v58, %v791_v57  ;;  %v795_v63 = vsel %vm794_vm6, %v791_v57, %v793_v58  ;;  %v2685_v48 = vrot.slane %v1930_v10, %v2551_v21  ;;  %v878_v57 = vld [vmem:[%s3043_s5] sm:$0xff] }
 0x19b   : > { %v811_v1 = vmul.f32 %v2603_v43, %v796_v62  ;;  %1962 = vmatprep.subr.bf16.mxu1 %v1961_v59  ;;  %v810_v15 = vmul.f32 %v2629_v61, %v795_v63  ;;  %v966_v63 = vld [vmem:[%s3045_s7] sm:$0xff] }
 0x19c   : > { %1964 = vmatpush1.bf16.msra.mxu1 %v1963_v56 }
 0x19d   : > { %v813_v11 = vpop.permute.xlu1 %812  ;;  %1966 = vmatprep.subr.bf16.mxu1 %v1965_v3  ;;  %v815_v12 = vpop.permute.xlu0 %814  ;;  %v1969_v19 = vpack.c.bf16 %v811_v1, %v789_v13  ;;  %v1971_v31 = vpack.c.bf16 %v810_v15, %v788_v24  ;;  %v1665_v15 = vld [vmem:[#allocation2 + $0x8] sm:$0xff]  ;;  %v1664_v24 = vld [vmem:[#allocation2] sm:$0xff] }
 0x19e   : > { %v817_v27 = vsel %vm816_vm7, %v813_v11, %v815_v12  ;;  %v818_v28 = vsel %vm816_vm7, %v815_v12, %v813_v11 }
 0x19f   : > { %v832_v39 = vmul.f32 %v2651_v17, %v817_v27  ;;  %v833_v40 = vmul.f32 %v2654_v18, %v818_v28  ;;  %v1666_v27 = vld [vmem:[#allocation2 + $0x10] sm:$0xff]  ;;  %v1669_v28 = vld [vmem:[#allocation2 + $0x28] sm:$0xff] }
 0x1a0   : > { %1968 = vmatpush1.bf16.msra.mxu1 %v1967_v14 }
 0x1a1   : > { %v835_v29 = vpop.permute.xlu1 %834  ;;  %1970 = vmatprep.subr.bf16.mxu1 %v1969_v19  ;;  %v837_v30 = vpop.permute.xlu0 %836  ;;  %v1667_v19 = vld [vmem:[#allocation2 + $0x18] sm:$0xff] }
 0x1a2   : > { %v839_v32 = vsel %vm838_vm8, %v835_v29, %v837_v30  ;;  %v840_v38 = vsel %vm838_vm8, %v837_v30, %v835_v29  ;;  %v1671_v29 = vld [vmem:[#allocation2 + $0x38] sm:$0xff] }
 0x1a3   : > { %v854_v41 = vmul.f32 %v2658_v20, %v839_v32  ;;  %v855_v42 = vmul.f32 %v2661_v23, %v840_v38  ;;  %v1583_v32 = vld [vmem:[%s3049_s11] sm:$0xff]  ;;  %v2027_v38 = vpack.c.bf16 %v1666_v27, %v1664_v24 }
 0x1a4   : > { %1972 = vmatpush1.bf16.msra.mxu1 %v1971_v31  ;;  %v2025_v31 = vpack.c.bf16 %v1667_v19, %v1665_v15  ;;  %v1690_v15 = vld [vmem:[#allocation2 + $0xd0] sm:$0xff]  ;;  %v1693_v19 = vld [vmem:[#allocation2 + $0xe8] sm:$0xff] }
 0x1a5   : > { %v1975_v44 = vpack.c.bf16 %v854_v41, %v832_v39  ;;  %v857_v45 = vpop.permute.xlu1 %856  ;;  %v859_v46 = vpop.permute.xlu0 %858  ;;  %v1973_v47 = vpack.c.bf16 %v855_v42, %v833_v40  ;;  %v1668_v39 = vld [vmem:[#allocation2 + $0x20] sm:$0xff]  ;;  %v1670_v40 = vld [vmem:[#allocation2 + $0x30] sm:$0xff]  ;;  %v1673_v41 = vld [vmem:[#allocation2 + $0x48] sm:$0xff] }
 0x1a6   : > { %v862_v49 = vsel %vm860_vm9, %v859_v46, %v857_v45  ;;  %v861_v50 = vsel %vm860_vm9, %v857_v45, %v859_v46  ;;  %v1675_v42 = vld [vmem:[#allocation2 + $0x58] sm:$0xff]  ;;  %v1672_v46 = vld [vmem:[#allocation2 + $0x40] sm:$0xff] }
 0x1a7   : > { %v877_v51 = vmul.f32 %v2678_v8, %v862_v49  ;;  %1974 = vmatprep.subr.bf16.mxu1 %v1973_v47  ;;  %v876_v56 = vmul.f32 %v2685_v48, %v861_v50  ;;  %v2033_v45 = vpack.c.bf16 %v1675_v42, %v1673_v41  ;;  %v1674_v47 = vld [vmem:[#allocation2 + $0x50] sm:$0xff]  ;;  %v1677_v49 = vld [vmem:[#allocation2 + $0x68] sm:$0xff]  ;;  %v1679_v50 = vld [vmem:[#allocation2 + $0x78] sm:$0xff] }
 0x1a8   : > { %1976 = vmatpush1.bf16.msra.mxu1 %v1975_v44  ;;  %v2031_v44 = vpack.c.bf16 %v1670_v40, %v1668_v39  ;;  %v1698_v39 = vld [vmem:[#allocation2 + $0x110] sm:$0xff]  ;;  %v1701_v40 = vld [vmem:[#allocation2 + $0x128] sm:$0xff]  ;;  %v1703_v41 = vld [vmem:[#allocation2 + $0x138] sm:$0xff] }
 0x1a9   : > { %905 = vmatprep.subr.mxu1 %v877_v51  ;;  %v1554_v54 = vpop.permute.xlu1 %1553  ;;  %v1556_v55 = vpop.permute.xlu0 %1555  ;;  %v2035_v51 = vpack.c.bf16 %v1674_v47, %v1672_v46  ;;  %v1702_v46 = vld [vmem:[#allocation2 + $0x130] sm:$0xff]  ;;  %v1705_v47 = vld [vmem:[#allocation2 + $0x148] sm:$0xff] }
 0x1aa   : > { %v1557_v58 = vsel %vm794_vm6, %v1554_v54, %v1556_v55  ;;  %v1558_v59 = vsel %vm794_vm6, %v1556_v55, %v1554_v54  ;;  %v2037_v54 = vpack.c.bf16 %v1679_v50, %v1677_v49  ;;  %v1676_v55 = vld [vmem:[#allocation2 + $0x60] sm:$0xff]  ;;  %v1707_v49 = vld [vmem:[#allocation2 + $0x158] sm:$0xff] }
 0x1ab   : > { %v1561_v1 = vcombine.low %v1557_v58, %v1558_v59  ;;  %v1683_v58 = vld [vmem:[#allocation2 + $0x98] sm:$0xff] }
 0x1ac   : > { %906 = vmatpush1.msra.mxu1 %v876_v56  ;;  %v1678_v56 = vld [vmem:[#allocation2 + $0x70] sm:$0xff] }
 0x1ad   : > { %1931 = vmatmul.mubr.msk.f32.vlgmr.msra.gmra.mrb[2].mxu1 %vm885_vm10, %v878_v57  ;;  %1932 = vmatprep.subr.msk.mxu1 %vm522_vm0, %v2475_v4  ;;  %v1565_v60 = vpop.permute.xlu1 %1564  ;;  %v1567_v62 = vpop.permute.xlu0 %1566  ;;  %v1563_v11 = vmax.f32 %v2468_v2, %v1561_v1  ;;  %v1681_v57 = vld [vmem:[#allocation2 + $0x88] sm:$0xff]  ;;  %v2039_v59 = vpack.c.bf16 %v1678_v56, %v1676_v55  ;;  %v1706_v55 = vld [vmem:[#allocation2 + $0x150] sm:$0xff] }
 0x1ae   : > { %1933 = vmatpush1.msk.msra.mxu1 %vm522_vm0, %v2468_v2  ;;  %1040 = vmatprep.mubr.f32.mxu1 %v2270_v0  ;;  %v1568_v3 = vsel %vm838_vm8, %v1565_v60, %v1567_v62  ;;  %v1569_v5 = vsel %vm838_vm8, %v1567_v62, %v1565_v60  ;;  %v2029_v2 = vpack.c.bf16 %v1671_v29, %v1669_v28  ;;  %v1680_v62 = vld [vmem:[#allocation2 + $0x80] sm:$0xff]  ;;  %v1685_v1 = vld [vmem:[#allocation2 + $0xa8] sm:$0xff]  ;;  %v1694_v29 = vld [vmem:[#allocation2 + $0xf0] sm:$0xff] }
 0x1af   : > { %v2041_v60 = vpack.c.bf16 %v1683_v58, %v1681_v57  ;;  %v1692_v28 = vld [vmem:[#allocation2 + $0xe0] sm:$0xff]  ;;  %v1709_v57 = vld [vmem:[#allocation2 + $0x168] sm:$0xff]  ;;  %v1711_v58 = vld [vmem:[#allocation2 + $0x178] sm:$0xff] }
 0x1b1   : > { %1934 = vmatmul.mubr.msk.f32.vlgmr.msra.gmra.mrb[4].mxu1 %vm518_vm1, %v966_v63  ;;  %v1571_v4 = vpop.permute.xlu1 %1570  ;;  %v1573_v6 = vpop.permute.xlu0 %1572  ;;  %v1682_v63 = vld [vmem:[#allocation2 + $0x90] sm:$0xff] }
 0x1b2   : > { %v1574_v9 = vsel %vm860_vm9, %v1571_v4, %v1573_v6  ;;  %v1575_v0 = vsel %vm860_vm9, %v1573_v6, %v1571_v4  ;;  %v1684_v6 = vld [vmem:[#allocation2 + $0xa0] sm:$0xff] }
 0x1b3   : > { %v1576_v12 = vmax.f32 %v1568_v3, %v1574_v9  ;;  %v1577_v13 = vmax.f32 %v1569_v5, %v1575_v0  ;;  %v1687_v3 = vld [vmem:[#allocation2 + $0xb8] sm:$0xff]  ;;  %v2043_v5 = vpack.c.bf16 %v1682_v63, %v1680_v62  ;;  %v1686_v9 = vld [vmem:[#allocation2 + $0xb0] sm:$0xff]  ;;  %v1689_v0 = vld [vmem:[#allocation2 + $0xc8] sm:$0xff] }
 0x1b4   : > { %v2045_v4 = vpack.c.bf16 %v1687_v3, %v1685_v1  ;;  %v1710_v62 = vld [vmem:[#allocation2 + $0x170] sm:$0xff]  ;;  %v1713_v1 = vld [vmem:[#allocation2 + $0x188] sm:$0xff]  ;;  %v1715_v3 = vld [vmem:[#allocation2 + $0x198] sm:$0xff] }
 0x1b5   : > { %v1580_v14 = vcombine.low %v1576_v12, %v1577_v13  ;;  %v2047_v12 = vpack.c.bf16 %v1686_v9, %v1684_v6  ;;  %v1714_v6 = vld [vmem:[#allocation2 + $0x190] sm:$0xff] }
 0x1b7   : > { %v1582_v10 = vmax.f32 %v1563_v11, %v1580_v14  ;;  %v1691_v11 = vld [vmem:[#allocation2 + $0xd8] sm:$0xff]  ;;  %v1688_v14 = vld [vmem:[#allocation2 + $0xc0] sm:$0xff] }
 0x1b8   : > { %v2049_v13 = vpack.c.bf16 %v1691_v11, %v1689_v0  ;;  %v2051_v24 = vpack.c.bf16 %v1690_v15, %v1688_v14  ;;  %v1717_v0 = vld [vmem:[#allocation2 + $0x1a8] sm:$0xff]  ;;  %v1719_v11 = vld [vmem:[#allocation2 + $0x1b8] sm:$0xff]  ;;  %v1718_v14 = vld [vmem:[#allocation2 + $0x1b0] sm:$0xff] }
 0x1b9   : > { %v1585_v30 = vcombine.high %v1582_v10, %v1582_v10 }
 0x1bb   : > { %1951 = vmatprep.subr.msk.mxu0 %vm522_vm0, %v1585_v30  ;;  %v1697_v30 = vld [vmem:[#allocation2 + $0x108] sm:$0xff] }
 0x1bc   : > { %1952 = vmatpush1.msk.msra.mxu0 %vm522_vm0, %v1582_v10  ;;  %v1695_v10 = vld [vmem:[#allocation2 + $0xf8] sm:$0xff]  ;;  %vm1160_vm0 = vcmp.lt.s32.totalorder %v2546_v16, 18 }
 0x1bd   : > { %1953 = vmatmul.mubr.msk.f32.vlgmr.msra.gmra.mrb[2].mxu0 %vm518_vm1, %v1583_v32  ;;  %2026 = vmatprep.subr.bf16.mxu0 %v2025_v31  ;;  %v2053_v27 = vpack.c.bf16 %v1695_v10, %v1693_v19  ;;  %v1699_v31 = vld [vmem:[#allocation2 + $0x118] sm:$0xff]  ;;  %v2055_v32 = vpack.c.bf16 %v1694_v29, %v1692_v28  ;;  %v1721_v19 = vld [vmem:[#allocation2 + $0x1c8] sm:$0xff]  ;;  %v1722_v28 = vld [vmem:[#allocation2 + $0x1d0] sm:$0xff]  ;;  %vm1206_vm1 = vcmp.lt.s32.totalorder %v2546_v16, 14 }
 0x1be   : > { %2028 = vmatpush1.bf16.msra.mxu0 %v2027_v38  ;;  %v2057_v38 = vpack.c.bf16 %v1699_v31, %v1697_v30  ;;  %v1723_v10 = vld [vmem:[#allocation2 + $0x1d8] sm:$0xff]  ;;  %v2725_v30 = vpop.f32.mrb[0].mxu0  ;;  %v1725_v31 = vld [vmem:[#allocation2 + $0x1e8] sm:$0xff] }
 0x1bf   : > { %2030 = vmatprep.subr.bf16.mxu0 %v2029_v2  ;;  %v1696_v2 = vld [vmem:[#allocation2 + $0x100] sm:$0xff] }
 0x1c0   : > { %v2059_v42 = vpack.c.bf16 %v1698_v39, %v1696_v2  ;;  %v1724_v2 = vld [vmem:[#allocation2 + $0x1e0] sm:$0xff]  ;;  %v1726_v39 = vld [vmem:[#allocation2 + $0x1f0] sm:$0xff] }
 0x1c2   : > { %2032 = vmatpush1.bf16.msra.mxu0 %v2031_v44  ;;  %v2061_v44 = vpack.c.bf16 %v1703_v41, %v1701_v40  ;;  %v2087_v40 = vpack.c.bf16 %v1726_v39, %v1724_v2  ;;  %v2727_v41 = vpop.f32.mrb[1].mxu0 }
 0x1c3   : > { %2034 = vmatprep.subr.bf16.mxu0 %v2033_v45  ;;  %v1700_v45 = vld [vmem:[#allocation2 + $0x120] sm:$0xff] }
 0x1c4   : > { %v2063_v50 = vpack.c.bf16 %v1702_v46, %v1700_v45  ;;  %v971_v45 = vpop.permute.xlu1 %970 }
 0x1c6   : > { %2036 = vmatpush1.bf16.msra.mxu0 %v2035_v51  ;;  %v2065_v51 = vpack.c.bf16 %v1707_v49, %v1705_v47 }
 0x1c7   : > { %2038 = vmatprep.subr.bf16.mxu0 %v2037_v54  ;;  %v1704_v54 = vld [vmem:[#allocation2 + $0x140] sm:$0xff] }
 0x1c8   : > { %v2067_v56 = vpack.c.bf16 %v1706_v55, %v1704_v54  ;;  %v1465_v55 = vld [vmem:[%s3047_s9 + $0x8] sm:$0xff] }
 0x1c9   : > { %1950 = vmatprep.mubr.msk.f32.mxu1 %vm885_vm10, %v1465_v55  ;;  %vm1446_vm10 = vcmp.lt.s32.totalorder %v2546_v16, 94 }
 0x1ca   : > { %2040 = vmatpush1.bf16.msra.mxu0 %v2039_v59  ;;  %v2069_v59 = vpack.c.bf16 %v1711_v58, %v1709_v57  ;;  %v879_v57 = vld [vmem:[%s3044_s6] sm:$0xff] }
 0x1cb   : > { %2042 = vmatprep.subr.bf16.mxu0 %v2041_v60  ;;  %v1708_v60 = vld [vmem:[#allocation2 + $0x160] sm:$0xff] }
 0x1cc   : > { %v2071_v63 = vpack.c.bf16 %v1710_v62, %v1708_v60  ;;  %v1466_v58 = vld [vmem:[%s3048_s10] sm:$0xff] }
 0x1cd   : > { %v1054_v60 = vld [vmem:[%s3052_s14] ss:$8 sm:$0x3] }
 0x1ce   : > { %2044 = vmatpush1.bf16.msra.mxu0 %v2043_v5  ;;  %v2073_v5 = vpack.c.bf16 %v1715_v3, %v1713_v1  ;;  %v1059_v3 = vrot.slane %v1054_v60, %v2551_v21 }
 0x1cf   : > { %2046 = vmatprep.subr.bf16.mxu0 %v2045_v4  ;;  %v1712_v4 = vld [vmem:[#allocation2 + $0x180] sm:$0xff] }
 0x1d0   : > { %v2075_v9 = vpack.c.bf16 %v1714_v6, %v1712_v4 }
 0x1d2   : > { %2048 = vmatpush1.bf16.msra.mxu0 %v2047_v12  ;;  %v2077_v12 = vpack.c.bf16 %v1719_v11, %v1717_v0 }
 0x1d3   : > { %2050 = vmatprep.subr.bf16.mxu0 %v2049_v13  ;;  %v1716_v13 = vld [vmem:[#allocation2 + $0x1a0] sm:$0xff] }
 0x1d4   : > { %v2079_v15 = vpack.c.bf16 %v1718_v14, %v1716_v13 }
 0x1d6   : > { %2052 = vmatpush1.bf16.msra.mxu0 %v2051_v24  ;;  %v2081_v24 = vpack.c.bf16 %v1723_v10, %v1721_v19 }
 0x1d7   : > { %2054 = vmatprep.subr.bf16.mxu0 %v2053_v27  ;;  %v1720_v27 = vld [vmem:[#allocation2 + $0x1c0] sm:$0xff] }
 0x1d8   : > { %v2083_v29 = vpack.c.bf16 %v1722_v28, %v1720_v27  ;;  %v1936_v27 = vld [vmem:[%s3052_s14 + $0x2] ss:$8 sm:$0x3] }
 0x1d9   : > { %v1103_v2 = vrot.slane %v1936_v27, %v2551_v21  ;;  %v1107_v39 = vrot.slane %v1936_v27, %v2553_v22 }
 0x1da   : > { %2056 = vmatpush1.bf16.msra.mxu0 %v2055_v32  ;;  %v1727_v32 = vld [vmem:[#allocation2 + $0x1f8] sm:$0xff] }
 0x1db   : > { %2058 = vmatprep.subr.bf16.mxu0 %v2057_v38  ;;  %v2085_v38 = vpack.c.bf16 %v1727_v32, %v1725_v31 }
 0x1de   : > { %2060 = vmatpush1.bf16.msra.mxu0 %v2059_v42 }
 0x1df   : > { %2062 = vmatprep.subr.bf16.mxu0 %v2061_v44 }
 0x1e2   : > { %2064 = vmatpush1.bf16.msra.mxu0 %v2063_v50 }
 0x1e3   : > { %2066 = vmatprep.subr.bf16.mxu0 %v2065_v51 }
 0x1e6   : > { %2068 = vmatpush1.bf16.msra.mxu0 %v2067_v56  ;;  %v510_v56 = vld [vmem:[%s3040_s2] sm:$0xff] }
 0x1e7   : > { %2070 = vmatprep.subr.bf16.mxu0 %v2069_v59  ;;  %v1728_v59 = vld [vmem:[%s3050_s12] sm:$0xff] }
 0x1ea   : > { %2072 = vmatpush1.bf16.msra.mxu0 %v2071_v63  ;;  %v1935_v63 = vld [vmem:[%s3052_s14 + $0x1] ss:$8 sm:$0x3] }
 0x1eb   : > { %2074 = vmatprep.subr.bf16.mxu0 %v2073_v5  ;;  %v1063_v5 = vrot.slane %v1054_v60, %v2553_v22  ;;  %v1081_v4 = vrot.slane %v1935_v63, %v2551_v21  ;;  %v1085_v6 = vrot.slane %v1935_v63, %v2553_v22 }
 0x1ee   : > { %2076 = vmatpush1.bf16.msra.mxu0 %v2075_v9 }
 0x1ef   : > { %2078 = vmatprep.subr.bf16.mxu0 %v2077_v12 }
 0x1f2   : > { %2080 = vmatpush1.bf16.msra.mxu0 %v2079_v15 }
 0x1f3   : > { %2082 = vmatprep.subr.bf16.mxu0 %v2081_v24 }
 0x1f6   : > { %2084 = vmatpush1.bf16.msra.mxu0 %v2083_v29  ;;  %v1937_v29 = vld [vmem:[%s3052_s14 + $0x3] ss:$8 sm:$0x3] }
 0x1f7   : > { %2086 = vmatprep.subr.bf16.mxu0 %v2085_v38 }
 0x1fa   : > { %2088 = vmatpush1.bf16.msra.mxu0 %v2087_v40  ;;  %v1125_v40 = vrot.slane %v1937_v29, %v2551_v21 }
 0x280   : > { %v2729_v42 = vpop.f32.mrb[2].mxu1 }
 0x281   : > { %v2731_v44 = vpop.f32.mrb[3].mxu1 }
 0x284   : > { %v1042_v46 = vpop.f32.mrb[4].mxu1 }
 0x285   : > { %v2733_v47 = vadd.f32 %v1042_v46, %v971_v45  ;;  %v1044_v49 = vpop.f32.mrb[5].mxu1 }
 0x286   : > { %v2735_v50 = vadd.f32 %v1044_v49, %v971_v45  ;;  %v1129_v45 = vrot.slane %v1937_v29, %v2553_v22 }
 0x287   : > { %1047 = vrot.lane.b32.xlu0 %v2733_v47, %s2280_s16 }
 0x288   : > { %1049 = vrot.lane.b32.xlu1 %v2735_v50, %s2280_s16  ;;  %s2286_s16 = smov 14  }
 0x28b   : > { %1068 = vrot.lane.b32.xlu0 %v2733_v47, %s2281_s20 }
 0x28c   : > { %1070 = vrot.lane.b32.xlu1 %v2735_v50, %s2281_s20  ;;  %s2287_s20 = smov 2  }
 0x28f   : > { %1090 = vrot.lane.b32.xlu0 %v2733_v47, %s2282_s17 }
 0x290   : > { %1092 = vrot.lane.b32.xlu1 %v2735_v50, %s2282_s17  ;;  %v1659_v51 = vpop.f32.mrb[2].mxu0  ;;  %s3080_s17 = smov 113  }
 0x291   : > { %v1661_v54 = vpop.f32.mrb[3].mxu0 }
 0x292   : > { %1798 = vmatprep.mubr.f32.mxu0 %v1661_v54 }
 0x293   : > { %1112 = vrot.lane.b32.xlu0 %v2733_v47, %s2283_s23  ;;  %1799 = vmatmul.mubr.f32.vlgmr.msra.gmra.mrb[4].mxu0 %v1659_v51 }
 0x294   : > { %1114 = vrot.lane.b32.xlu1 %v2735_v50, %s2283_s23  ;;  %s2290_s23 = smov 110  }
 0x297   : > { %1134 = vrot.lane.b32.xlu0 %v2733_v47, %s2284_s30 }
 0x298   : > { %1136 = vrot.lane.b32.xlu1 %v2735_v50, %s2284_s30  ;;  %s2291_s30 = smov 98  }
 0x29b   : > { %1156 = vrot.lane.b32.xlu0 %v2733_v47, %s2285_s24 }
 0x29c   : > { %1158 = vrot.lane.b32.xlu1 %v2735_v50, %s2285_s24  ;;  %s2292_s24 = smov 97  }
 0x29f   : > { %1178 = vrot.lane.b32.xlu0 %v2733_v47, %s2273_s26 }
 0x2a0   : > { %1180 = vrot.lane.b32.xlu1 %v2735_v50, %s2273_s26  ;;  %s2288_s26 = smov 126  }
 0x2a3   : > { %1186 = vrot.lane.b32.xlu0 %v2733_v47, %s2272_s25 }
 0x2a4   : > { %1188 = vrot.lane.b32.xlu1 %v2735_v50, %s2272_s25 }
 0x2a7   : > { %1194 = vrot.lane.b32.xlu0 %v2733_v47, %s2274_s18 }
 0x2a8   : > { %1196 = vrot.lane.b32.xlu1 %v2735_v50, %s2274_s18  ;;  %s2289_s18 = smov 114  }
 0x2ab   : > { %1202 = vrot.lane.b32.xlu0 %v2733_v47, %s2286_s16 }
 0x2ac   : > { %1204 = vrot.lane.b32.xlu1 %v2735_v50, %s2286_s16  ;;  %s2293_s16 = smov 96  }
 0x2af   : > { %1224 = vrot.lane.b32.xlu0 %v2733_v47, %s2287_s20 }
 0x2b0   : > { %1226 = vrot.lane.b32.xlu1 %v2735_v50, %s2287_s20 }
 0x2b3   : > { %1246 = vrot.lane.b32.xlu0 %v2733_v47, %s2275_s27 }
 0x2b4   : > { %1248 = vrot.lane.b32.xlu1 %v2735_v50, %s2275_s27  ;;  %s3081_s27 = smov 112  }
 0x2b7   : > { %1256 = vrot.lane.b32.xlu0 %v2733_v47, %s2276_s29 }
 0x2b8   : > { %1258 = vrot.lane.b32.xlu1 %v2735_v50, %s2276_s29  ;;  %s3082_s29 = smov 111  }
 0x2bb   : > { %1264 = vrot.lane.b32.xlu0 %v2733_v47, %s2288_s26 }
 0x2bc   : > { %1266 = vrot.lane.b32.xlu1 %v2735_v50, %s2288_s26 }
 0x2bf   : > { %1286 = vrot.lane.b32.xlu0 %v2733_v47, %s2289_s18 }
 0x2c0   : > { %1288 = vrot.lane.b32.xlu1 %v2735_v50, %s2289_s18  ;;  %s2294_s18 = smov 95  }
 0x2c3   : > { %1308 = vrot.lane.b32.xlu0 %v2733_v47, %s3080_s17 }
 0x2c4   : > { %1310 = vrot.lane.b32.xlu1 %v2735_v50, %s3080_s17  ;;  %s2295_s17 = smov 94  }
 0x2c7   : > { %1316 = vrot.lane.b32.xlu0 %v2733_v47, %s3081_s27 }
 0x2c8   : > { %1318 = vrot.lane.b32.xlu1 %v2735_v50, %s3081_s27 }
 0x2cb   : > { %1324 = vrot.lane.b32.xlu0 %v2733_v47, %s3082_s29 }
 0x2cc   : > { %1326 = vrot.lane.b32.xlu1 %v2735_v50, %s3082_s29  ;;  %s2296_s29 = smov [#allocation5]  }
 0x2cf   : > { %1332 = vrot.lane.b32.xlu0 %v2733_v47, %s2290_s23 }
 0x2d0   : > { %1334 = vrot.lane.b32.xlu1 %v2735_v50, %s2290_s23  ;;  %s500_s23 = sand.u32 1, %s2257_s19  }
 0x2d3   : > { %1354 = vrot.lane.b32.xlu0 %v2733_v47, %s2291_s30 }
 0x2d4   : > { %1356 = vrot.lane.b32.xlu1 %v2735_v50, %s2291_s30  ;;  %s1913_s30 = sshll.u32 %s500_s23, 6 }
 0x2d7   : > { %1376 = vrot.lane.b32.xlu0 %v2733_v47, %s2292_s24 }
 0x2d8   : > { %1378 = vrot.lane.b32.xlu1 %v2735_v50, %s2292_s24  ;;  %s2975_s24 = scalar_lea.vmem [#allocation5], %s1913_s30  ;;  %s2203_s30 = sshll.u32 %s2296_s29, 4  ;;  %s2204_s30 = int_to_ptr.vmem [resolvable:$false] %s2203_s30 }
 0x2d9   : > { %s1833_s20 = sshll.u32 %s2975_s24, 4  ;;  %s2990_s20 = int_to_ptr.vmem [resolvable:$true] %s1833_s20 }
 0x2da   : > { %s2199_s27 = scalar_lea.vmem %s2990_s20, 1024  ;;  %p2206_p2 = scmp.lt.s32.totalorder %s2990_s20, %s2204_s30 }
 0x2db   : > { %1398 = vrot.lane.b32.xlu0 %v2733_v47, %s2293_s16  ;;  %p2200_p6 = scmp.ne.s32.totalorder %s2990_s20, %s2199_s27 }
 0x2dc   : > { %1400 = vrot.lane.b32.xlu1 %v2735_v50, %s2293_s16  ;;  %s1960_s16 = sshll.u32 %s2399_s22, 10  ;;  %s2996_s22 = scalar_lea.sflag [#allocation4], %s500_s23 }
 0x2dd   : > { %p2201_p10 = pnand %p2200_p6, %p3083_p9 }
 0x2df   : > { %1420 = vrot.lane.b32.xlu0 %v2733_v47, %s2294_s18  ;;  %p2202_p12 = pneg %p2201_p10 }
 0x2e0   : > { %1422 = vrot.lane.b32.xlu1 %v2735_v50, %s2294_s18 }
 0x2e3   : > { %1442 = vrot.lane.b32.xlu0 %v2733_v47, %s2295_s17 }
 0x2e4   : > { %1444 = vrot.lane.b32.xlu1 %v2735_v50, %s2295_s17  ;;  %s2988_s17 = scalar_lea.hbm %s3053_s15, %s1960_s16  ;;  %s2205_s16 = scalar_lea.vmem %s2204_s30, 2048 }
 0x2e5   : > { %p2207_p3 = scmp.lt.s32.totalorder %s2205_s16, %s2199_s27 }
 0x2e7   : > { %513 = vperm.xlu0 %2168, %v510_v56   ;;  %p2208_p4 = por %p2207_p3, %p2206_p2 }
 0x2e8   : > { %882 = vperm.xlu1 %2169, %v879_v57  }
 0x2e9   : > { %p2209_p7 = pnand %p2208_p4, %p2202_p12 }
 0x2eb   : > { %1469 = vperm.xlu0 %2168, %v1466_v58  }
 0x2ec   : > { %1731 = vperm.xlu1 %2169, %v1728_v59  }
 0x2f9   : > { %v1048_v62 = vpop.permute.xlu0 %1047 }
 0x2fa   : > { %v1050_v1 = vpop.permute.xlu1 %1049 }
 0x2fb   : > { %v1052_v9 = vsel %vm1051_vm11, %v1048_v62, %v1050_v1  ;;  %v1053_v0 = vsel %vm1051_vm11, %v1050_v1, %v1048_v62  ;;  %v1938_v62 = vld [vmem:[%s3052_s14 + $0x4] ss:$8 sm:$0x3]  ;;  %v1939_v1 = vld [vmem:[%s3052_s14 + $0x5] ss:$8 sm:$0x3] }
 0x2fc   : > { %v1066_v15 = vmul.f32 %v1059_v3, %v1053_v0  ;;  %v1067_v19 = vmul.f32 %v1063_v5, %v1052_v9  ;;  %v1151_v9 = vrot.slane %v1938_v62, %v2553_v22  ;;  %v1169_v0 = vrot.slane %v1939_v1, %v2551_v21 }
 0x2fd   : > { %v1069_v11 = vpop.permute.xlu0 %1068 }
 0x2fe   : > { %v1071_v12 = vpop.permute.xlu1 %1070 }
 0x2ff   : > { %v1073_v13 = vsel %vm1072_vm12, %v1069_v11, %v1071_v12  ;;  %v1074_v14 = vsel %vm1072_vm12, %v1071_v12, %v1069_v11  ;;  %v1173_v11 = vrot.slane %v1939_v1, %v2553_v22 }
 0x300   : > { %v1088_v10 = vmul.f32 %v1081_v4, %v1074_v14  ;;  %v1089_v24 = vmul.f32 %v1085_v6, %v1073_v13  ;;  %v1147_v6 = vrot.slane %v1938_v62, %v2551_v21 }
 0x301   : > { %v1091_v28 = vpop.permute.xlu0 %1090 }
 0x302   : > { %v1979_v31 = vpack.c.bf16 %v1088_v10, %v1066_v15  ;;  %v1093_v32 = vpop.permute.xlu1 %1092  ;;  %v1977_v38 = vpack.c.bf16 %v1089_v24, %v1067_v19 }
 0x303   : > { %v1095_v46 = vsel %vm1094_vm13, %v1091_v28, %v1093_v32  ;;  %v1096_v49 = vsel %vm1094_vm13, %v1093_v32, %v1091_v28 }
 0x304   : > { %1978 = vmatprep.subr.bf16.mxu1 %v1977_v38  ;;  %v1110_v57 = vmul.f32 %v1103_v2, %v1096_v49  ;;  %v1111_v58 = vmul.f32 %v1107_v39, %v1095_v46 }
 0x305   : > { %1980 = vmatpush1.bf16.msra.mxu1 %v1979_v31  ;;  %v1113_v51 = vpop.permute.xlu0 %1112 }
 0x306   : > { %v1115_v54 = vpop.permute.xlu1 %1114 }
 0x307   : > { %v1117_v55 = vsel %vm1116_vm14, %v1113_v51, %v1115_v54  ;;  %v1118_v56 = vsel %vm1116_vm14, %v1115_v54, %v1113_v51 }
 0x308   : > { %v1132_v59 = vmul.f32 %v1125_v40, %v1118_v56  ;;  %v1133_v60 = vmul.f32 %v1129_v45, %v1117_v55 }
 0x309   : > { %v1135_v63 = vpop.permute.xlu0 %1134 }
 0x30a   : > { %v1983_v3 = vpack.c.bf16 %v1132_v59, %v1110_v57  ;;  %v1137_v5 = vpop.permute.xlu1 %1136  ;;  %v1981_v4 = vpack.c.bf16 %v1133_v60, %v1111_v58  ;;  %v1940_v59 = vld [vmem:[%s3052_s14 + $0x11] ss:$8 sm:$0x3] }
 0x30b   : > { %v1139_v12 = vsel %vm1138_vm15, %v1135_v63, %v1137_v5  ;;  %v1140_v13 = vsel %vm1138_vm15, %v1137_v5, %v1135_v63  ;;  %v1215_v1 = vrot.slane %v1940_v59, %v2551_v21 }
 0x30c   : > { %1982 = vmatprep.subr.bf16.mxu1 %v1981_v4  ;;  %v1154_v24 = vmul.f32 %v1147_v6, %v1140_v13  ;;  %v1155_v27 = vmul.f32 %v1151_v9, %v1139_v12  ;;  %v1941_v13 = vld [vmem:[%s3052_s14 + $0x12] ss:$8 sm:$0x3] }
 0x30d   : > { %1984 = vmatpush1.bf16.msra.mxu1 %v1983_v3  ;;  %v1157_v14 = vpop.permute.xlu0 %1156 }
 0x30e   : > { %v1159_v15 = vpop.permute.xlu1 %1158 }
 0x30f   : > { %v1161_v19 = vsel %vm1160_vm0, %v1157_v14, %v1159_v15  ;;  %v1162_v10 = vsel %vm1160_vm0, %v1159_v15, %v1157_v14 }
 0x310   : > { %v1176_v28 = vmul.f32 %v1169_v0, %v1162_v10  ;;  %v1177_v29 = vmul.f32 %v1173_v11, %v1161_v19  ;;  %v1237_v10 = vrot.slane %v1941_v13, %v2551_v21 }
 0x311   : > { %v1179_v31 = vpop.permute.xlu0 %1178 }
 0x312   : > { %v1987_v32 = vpack.c.bf16 %v1176_v28, %v1154_v24  ;;  %v1181_v38 = vpop.permute.xlu1 %1180  ;;  %v1985_v2 = vpack.c.bf16 %v1177_v29, %v1155_v27  ;;  %v1241_v24 = vrot.slane %v1941_v13, %v2553_v22 }
 0x313   : > { %v1182_v39 = vsel %vm691_vm4, %v1179_v31, %v1181_v38  ;;  %v1183_v40 = vsel %vm691_vm4, %v1181_v38, %v1179_v31  ;;  %vm1290_vm4 = vcmp.lt.s32.totalorder %v2546_v16, 114 }
 0x314   : > { %1986 = vmatprep.subr.bf16.mxu1 %v1985_v2  ;;  %v1184_v54 = vmul.f32 %v1183_v40, %v2581_v33  ;;  %v1185_v55 = vmul.f32 %v1182_v39, %v2584_v34  ;;  %v1219_v33 = vrot.slane %v1940_v59, %v2553_v22  ;;  %v1943_v59 = vld [vmem:[%s3052_s14 + $0x17] ss:$8 sm:$0x3] }
 0x315   : > { %1988 = vmatpush1.bf16.msra.mxu1 %v1987_v32  ;;  %v1187_v45 = vpop.permute.xlu0 %1186 }
 0x316   : > { %v1189_v46 = vpop.permute.xlu1 %1188 }
 0x317   : > { %v1190_v49 = vsel %vm713_vm2, %v1187_v45, %v1189_v46  ;;  %v1191_v51 = vsel %vm713_vm2, %v1189_v46, %v1187_v45  ;;  %vm1228_vm2 = vcmp.lt.s32.totalorder %v2546_v16, 2 }
 0x318   : > { %v1192_v56 = vmul.f32 %v1191_v51, %v2563_v25  ;;  %v1193_v57 = vmul.f32 %v1190_v49, %v2566_v26 }
 0x319   : > { %v1195_v58 = vpop.permute.xlu0 %1194 }
 0x31a   : > { %v1991_v60 = vpack.c.bf16 %v1192_v56, %v1184_v54  ;;  %v1197_v62 = vpop.permute.xlu1 %1196  ;;  %v1989_v63 = vpack.c.bf16 %v1193_v57, %v1185_v55  ;;  %v1254_v55 = vmul.f32 %v2733_v47, %v2641_v7 }
 0x31b   : > { %v1198_v25 = vsel %vm735_vm3, %v1195_v58, %v1197_v62  ;;  %v1199_v26 = vsel %vm735_vm3, %v1197_v62, %v1195_v58  ;;  %vm1268_vm3 = vcmp.lt.s32.totalorder %v2546_v16, 126 }
 0x31c   : > { %1990 = vmatprep.subr.bf16.mxu1 %v1989_v63  ;;  %v1200_v6 = vmul.f32 %v1199_v26, %v2619_v52  ;;  %v1201_v9 = vmul.f32 %v1198_v25, %v2591_v36 }
 0x31d   : > { %1992 = vmatpush1.bf16.msra.mxu1 %v1991_v60  ;;  %v1203_v34 = vpop.permute.xlu0 %1202 }
 0x31e   : > { %v1205_v3 = vpop.permute.xlu1 %1204 }
 0x31f   : > { %v1207_v5 = vsel %vm1206_vm1, %v1203_v34, %v1205_v3  ;;  %v1208_v4 = vsel %vm1206_vm1, %v1205_v3, %v1203_v34 }
 0x320   : > { %v1222_v0 = vmul.f32 %v1215_v1, %v1208_v4  ;;  %v1223_v11 = vmul.f32 %v1219_v33, %v1207_v5 }
 0x321   : > { %v1225_v12 = vpop.permute.xlu0 %1224 }
 0x322   : > { %v1995_v14 = vpack.c.bf16 %v1222_v0, %v1200_v6  ;;  %v1227_v15 = vpop.permute.xlu1 %1226  ;;  %v1993_v19 = vpack.c.bf16 %v1223_v11, %v1201_v9 }
 0x323   : > { %v1229_v52 = vsel %vm1228_vm2, %v1225_v12, %v1227_v15  ;;  %v1230_v27 = vsel %vm1228_vm2, %v1227_v15, %v1225_v12 }
 0x324   : > { %1994 = vmatprep.subr.bf16.mxu1 %v1993_v19  ;;  %v1244_v32 = vmul.f32 %v1237_v10, %v1230_v27  ;;  %v1245_v38 = vmul.f32 %v1241_v24, %v1229_v52 }
 0x325   : > { %1996 = vmatpush1.bf16.msra.mxu1 %v1995_v14  ;;  %v1247_v36 = vpop.permute.xlu0 %1246 }
 0x326   : > { %v1249_v28 = vpop.permute.xlu1 %1248 }
 0x327   : > { %v1250_v29 = vsel %vm757_vm5, %v1247_v36, %v1249_v28  ;;  %v1251_v31 = vsel %vm757_vm5, %v1249_v28, %v1247_v36  ;;  %vm1336_vm5 = vcmp.lt.s32.totalorder %v2546_v16, 110 }
 0x328   : > { %v1252_v2 = vmul.f32 %v1251_v31, %v2594_v37  ;;  %v1253_v39 = vmul.f32 %v1250_v29, %v2588_v35  ;;  %v1942_v35 = vld [vmem:[%s3052_s14 + $0x16] ss:$8 sm:$0x3]  ;;  %v1255_v37 = vmul.f32 %v2735_v50, %v2622_v53  ;;  %v1299_v53 = vrot.slane %v1943_v59, %v2551_v21  ;;  %v1944_v29 = vld [vmem:[%s3052_s14 + $0x23] ss:$8 sm:$0x3] }
 0x329   : > { %v1257_v40 = vpop.permute.xlu0 %1256  ;;  %v1281_v47 = vrot.slane %v1942_v35, %v2553_v22  ;;  %v1303_v50 = vrot.slane %v1943_v59, %v2553_v22 }
 0x32a   : > { %v1999_v45 = vpack.c.bf16 %v1252_v2, %v1244_v32  ;;  %v1259_v46 = vpop.permute.xlu1 %1258  ;;  %v1997_v49 = vpack.c.bf16 %v1253_v39, %v1245_v38  ;;  %v1345_v2 = vrot.slane %v1944_v29, %v2551_v21 }
 0x32b   : > { %v1260_v51 = vsel %vm794_vm6, %v1257_v40, %v1259_v46  ;;  %v1261_v54 = vsel %vm794_vm6, %v1259_v46, %v1257_v40  ;;  %vm1358_vm6 = vcmp.lt.s32.totalorder %v2546_v16, 98 }
 0x32c   : > { %v1262_v56 = vmul.f32 %v1260_v51, %v2629_v61  ;;  %v1263_v57 = vmul.f32 %v1261_v54, %v2603_v43  ;;  %1998 = vmatprep.subr.bf16.mxu1 %v1997_v49  ;;  %v1277_v43 = vrot.slane %v1942_v35, %v2551_v21 }
 0x32d   : > { %2000 = vmatpush1.bf16.msra.mxu1 %v1999_v45  ;;  %v1265_v58 = vpop.permute.xlu0 %1264 }
 0x32e   : > { %v2003_v60 = vpack.c.bf16 %v1262_v56, %v1254_v55  ;;  %v1267_v61 = vpop.permute.xlu1 %1266  ;;  %v2001_v7 = vpack.c.bf16 %v1263_v57, %v1255_v37  ;;  %v1945_v55 = vld [vmem:[%s3052_s14 + $0x24] ss:$8 sm:$0x3]  ;;  %v1946_v57 = vld [vmem:[%s3052_s14 + $0x25] ss:$8 sm:$0x3] }
 0x32f   : > { %v1269_v62 = vsel %vm1268_vm3, %v1265_v58, %v1267_v61  ;;  %v1270_v63 = vsel %vm1268_vm3, %v1267_v61, %v1265_v58  ;;  %v1389_v59 = vrot.slane %v1946_v57, %v2551_v21 }
 0x330   : > { %2002 = vmatprep.subr.bf16.mxu1 %v2001_v7  ;;  %v1284_v34 = vmul.f32 %v1277_v43, %v1269_v62  ;;  %v1285_v3 = vmul.f32 %v1281_v47, %v1270_v63 }
 0x331   : > { %v1287_v1 = vpop.permute.xlu0 %1286  ;;  %2004 = vmatpush1.bf16.msra.mxu1 %v2003_v60  ;;  %v1393_v60 = vrot.slane %v1946_v57, %v2553_v22 }
 0x332   : > { %v1289_v33 = vpop.permute.xlu1 %1288 }
 0x333   : > { %v1291_v25 = vsel %vm1290_vm4, %v1287_v1, %v1289_v33  ;;  %v1292_v26 = vsel %vm1290_vm4, %v1289_v33, %v1287_v1 }
 0x334   : > { %v1306_v5 = vmul.f32 %v1299_v53, %v1291_v25  ;;  %v1307_v4 = vmul.f32 %v1303_v50, %v1292_v26  ;;  %v1947_v25 = vld [vmem:[%s3052_s14 + $0x26] ss:$8 sm:$0x3] }
 0x335   : > { %v1309_v6 = vpop.permute.xlu0 %1308 }
 0x336   : > { %v2007_v9 = vpack.c.bf16 %v1306_v5, %v1284_v34  ;;  %v1311_v0 = vpop.permute.xlu1 %1310  ;;  %v2005_v11 = vpack.c.bf16 %v1307_v4, %v1285_v3  ;;  %v1948_v34 = vld [vmem:[%s3052_s14 + $0x27] ss:$8 sm:$0x3] }
 0x337   : > { %v1312_v12 = vsel %vm816_vm7, %v1309_v6, %v1311_v0  ;;  %v1313_v13 = vsel %vm816_vm7, %v1311_v0, %v1309_v6  ;;  %vm1380_vm7 = vcmp.lt.s32.totalorder %v2546_v16, 97  ;;  %v1411_v6 = vrot.slane %v1947_v25, %v2551_v21 }
 0x338   : > { %2006 = vmatprep.subr.bf16.mxu1 %v2005_v11  ;;  %v1314_v24 = vmul.f32 %v1312_v12, %v2651_v17  ;;  %v1315_v52 = vmul.f32 %v1313_v13, %v2654_v18  ;;  %v1349_v17 = vrot.slane %v1944_v29, %v2553_v22  ;;  %v1433_v0 = vrot.slane %v1948_v34, %v2551_v21  ;;  %v1949_v12 = vld [vmem:[%s3052_s14 + $0x30] ss:$8 sm:$0x3] }
 0x339   : > { %v1317_v14 = vpop.permute.xlu0 %1316  ;;  %2008 = vmatpush1.bf16.msra.mxu1 %v2007_v9  ;;  %v1415_v9 = vrot.slane %v1947_v25, %v2553_v22  ;;  %v1437_v11 = vrot.slane %v1948_v34, %v2553_v22 }
 0x33a   : > { %v1319_v15 = vpop.permute.xlu1 %1318 }
 0x33b   : > { %v1320_v19 = vsel %vm838_vm8, %v1317_v14, %v1319_v15  ;;  %v1321_v10 = vsel %vm838_vm8, %v1319_v15, %v1317_v14  ;;  %vm1402_vm8 = vcmp.lt.s32.totalorder %v2546_v16, 96 }
 0x33c   : > { %v1322_v27 = vmul.f32 %v1320_v19, %v2658_v20  ;;  %v1323_v36 = vmul.f32 %v1321_v10, %v2661_v23 }
 0x33d   : > { %v1325_v28 = vpop.permute.xlu0 %1324 }
 0x33e   : > { %v2011_v31 = vpack.c.bf16 %v1322_v27, %v1314_v24  ;;  %v1327_v32 = vpop.permute.xlu1 %1326  ;;  %v2009_v38 = vpack.c.bf16 %v1323_v36, %v1315_v52  ;;  %v1459_v52 = vrot.slane %v1949_v12, %v2553_v22 }
 0x33f   : > { %v1328_v18 = vsel %vm860_vm9, %v1325_v28, %v1327_v32  ;;  %v1329_v20 = vsel %vm860_vm9, %v1327_v32, %v1325_v28  ;;  %vm1424_vm9 = vcmp.lt.s32.totalorder %v2546_v16, 95 }
 0x340   : > { %2010 = vmatprep.subr.bf16.mxu1 %v2009_v38  ;;  %v1330_v46 = vmul.f32 %v1328_v18, %v2685_v48  ;;  %v1331_v49 = vmul.f32 %v1329_v20, %v2678_v8  ;;  %v1367_v48 = vrot.slane %v1945_v55, %v2551_v21  ;;  %v1371_v8 = vrot.slane %v1945_v55, %v2553_v22  ;;  %v1464_v22 = vld [vmem:[%s3047_s9] sm:$0xff] }
 0x341   : > { %v1333_v23 = vpop.permute.xlu0 %1332  ;;  %2012 = vmatpush1.bf16.msra.mxu1 %v2011_v31 }
 0x342   : > { %v1335_v39 = vpop.permute.xlu1 %1334 }
 0x343   : > { %v1337_v40 = vsel %vm1336_vm5, %v1333_v23, %v1335_v39  ;;  %v1338_v45 = vsel %vm1336_vm5, %v1335_v39, %v1333_v23 }
 0x344   : > { %v1352_v51 = vmul.f32 %v1345_v2, %v1337_v40  ;;  %v1353_v54 = vmul.f32 %v1349_v17, %v1338_v45  ;;  %v1455_v17 = vrot.slane %v1949_v12, %v2551_v21 }
 0x345   : > { %v1355_v56 = vpop.permute.xlu0 %1354 }
 0x346   : > { %v2015_v35 = vpack.c.bf16 %v1352_v51, %v1330_v46  ;;  %v1357_v37 = vpop.permute.xlu1 %1356  ;;  %v2013_v58 = vpack.c.bf16 %v1353_v54, %v1331_v49 }
 0x347   : > { %v1359_v61 = vsel %vm1358_vm6, %v1355_v56, %v1357_v37  ;;  %v1360_v7 = vsel %vm1358_vm6, %v1357_v37, %v1355_v56 }
 0x348   : > { %2014 = vmatprep.subr.bf16.mxu1 %v2013_v58  ;;  %v1374_v62 = vmul.f32 %v1367_v48, %v1359_v61  ;;  %v1375_v63 = vmul.f32 %v1371_v8, %v1360_v7 }
 0x349   : > { %v1377_v43 = vpop.permute.xlu0 %1376  ;;  %2016 = vmatpush1.bf16.msra.mxu1 %v2015_v35 }
 0x34a   : > { %v1379_v47 = vpop.permute.xlu1 %1378 }
 0x34b   : > { %v1381_v53 = vsel %vm1380_vm7, %v1377_v43, %v1379_v47  ;;  %v1382_v50 = vsel %vm1380_vm7, %v1379_v47, %v1377_v43 }
 0x34c   : > { %v1396_v1 = vmul.f32 %v1389_v59, %v1381_v53  ;;  %v1397_v33 = vmul.f32 %v1393_v60, %v1382_v50 }
 0x34d   : > { %v1399_v26 = vpop.permute.xlu0 %1398 }
 0x34e   : > { %v2019_v3 = vpack.c.bf16 %v1396_v1, %v1374_v62  ;;  %v1401_v5 = vpop.permute.xlu1 %1400  ;;  %v2017_v4 = vpack.c.bf16 %v1397_v33, %v1375_v63 }
 0x34f   : > { %v1403_v13 = vsel %vm1402_vm8, %v1399_v26, %v1401_v5  ;;  %v1404_v14 = vsel %vm1402_vm8, %v1401_v5, %v1399_v26 }
 0x350   : > { %2018 = vmatprep.subr.bf16.mxu1 %v2017_v4  ;;  %v1418_v27 = vmul.f32 %v1411_v6, %v1403_v13  ;;  %v1419_v36 = vmul.f32 %v1415_v9, %v1404_v14 }
 0x351   : > { %v1421_v15 = vpop.permute.xlu0 %1420  ;;  %2020 = vmatpush1.bf16.msra.mxu1 %v2019_v3 }
 0x352   : > { %v1423_v19 = vpop.permute.xlu1 %1422 }
 0x353   : > { %v1425_v10 = vsel %vm1424_vm9, %v1421_v15, %v1423_v19  ;;  %v1426_v24 = vsel %vm1424_vm9, %v1423_v19, %v1421_v15 }
 0x354   : > { %v1440_v28 = vmul.f32 %v1433_v0, %v1425_v10  ;;  %v1441_v29 = vmul.f32 %v1437_v11, %v1426_v24 }
 0x355   : > { %v1443_v31 = vpop.permute.xlu0 %1442 }
 0x356   : > { %v2023_v32 = vpack.c.bf16 %v1440_v28, %v1418_v27  ;;  %v1445_v38 = vpop.permute.xlu1 %1444  ;;  %v2021_v2 = vpack.c.bf16 %v1441_v29, %v1419_v36 }
 0x357   : > { %v1448_v18 = vsel %vm1446_vm10, %v1445_v38, %v1443_v31  ;;  %v1447_v20 = vsel %vm1446_vm10, %v1443_v31, %v1445_v38 }
 0x358   : > { %v1463_v23 = vmul.f32 %v1459_v52, %v1448_v18  ;;  %2022 = vmatprep.subr.bf16.mxu1 %v2021_v2  ;;  %v1462_v16 = vmul.f32 %v1455_v17, %v1447_v20 }
 0x359   : > { %2024 = vmatpush1.bf16.msra.mxu1 %v2023_v32 }
 0x35a   : > { %1523 = vmatprep.subr.mxu1 %v1463_v23 }
 0x35d   : > { %1524 = vmatpush1.msra.mxu1 %v1462_v16 }
 0x35e   : > { %1540 = vmatmul.mubr.f32.vlgmr.msra.gmra.mrb[6].mxu1 %v1464_v22 }
 0x366   : > { %v514_v39 = vpop.permute.xlu0 %513  ;;  %v1800_v40 = vpop.f32.mrb[4].mxu0 }
 0x367   : > { %v594_v21 = vadd.f32 %v2725_v30, %v514_v39  ;;  %v596_v45 = vadd.f32 %v2727_v41, %v514_v39  ;;  %v883_v46 = vpop.permute.xlu1 %882  ;;  %v1802_v49 = vpop.f32.mrb[5].mxu0 }
 0x368   : > { %v956_v51 = vadd.f32 %v2729_v42, %v883_v46  ;;  %v958_v54 = vadd.f32 %v2731_v44, %v883_v46 }
 0x369   : > { %vm598_vm11 = vcmp.ge.f32.partialorder %v594_v21, 0.0  ;;  %vm599_vm12 = vcmp.ge.f32.partialorder %v596_v45, 0.0  ;;  %v600_v55 = vmul.f32 0.01, %v594_v21  ;;  %v601_v56 = vmul.f32 0.01, %v596_v45 }
 0x36a   : > { %vm960_vm13 = vcmp.ge.f32.partialorder %v956_v51, 0.0  ;;  %vm961_vm14 = vcmp.ge.f32.partialorder %v958_v54, 0.0  ;;  %v962_v57 = vmul.f32 0.01, %v956_v51  ;;  %v963_v35 = vmul.f32 0.01, %v958_v54  ;;  %v1470_v7 = vpop.permute.xlu0 %1469 }
 0x36b   : > { %v602_v37 = vsel %vm598_vm11, %v594_v21, %v600_v55  ;;  %v603_v58 = vsel %vm599_vm12, %v596_v45, %v601_v56  ;;  %v1732_v48 = vpop.permute.xlu1 %1731 }
 0x36c   : > { %1811 = vst [vmem:[%s2975_s24] sm:$0xff] %v602_v37  ;;  %1812 = vst [vmem:[%s2975_s24 + $0x8] sm:$0xff] %v603_v58  ;;  %v964_v30 = vsel %vm960_vm13, %v956_v51, %v962_v57  ;;  %v965_v41 = vsel %vm961_vm14, %v958_v54, %v963_v35  ;;  %v1801_v42 = vadd.f32 %v1800_v40, %v1732_v48 }
 0x36d   : > { %v1803_v44 = vadd.f32 %v1802_v49, %v1732_v48  ;;  %1813 = vst [vmem:[%s2975_s24 + $0x10] sm:$0xff] %v964_v30  ;;  %1814 = vst [vmem:[%s2975_s24 + $0x18] sm:$0xff] %v965_v41 }
 0x36e   : > { %vm1805_vm15 = vcmp.ge.f32.partialorder %v1801_v42, 0.0  ;;  %v1807_v8 = vmul.f32 0.01, %v1801_v42 }
 0x36f   : > { %vm1806_vm0 = vcmp.ge.f32.partialorder %v1803_v44, 0.0  ;;  %v1808_v59 = vmul.f32 0.01, %v1803_v44 }
 0x370   : > { %v1809_v60 = vsel %vm1805_vm15, %v1801_v42, %v1807_v8 }
 0x371   : > { %v1810_v61 = vsel %vm1806_vm0, %v1803_v44, %v1808_v59  ;;  %1817 = vst [vmem:[%s2975_s24 + $0x30] sm:$0xff] %v1809_v60 }
 0x372   : > { %1818 = vst [vmem:[%s2975_s24 + $0x38] sm:$0xff] %v1810_v61 }
 0x431   : > { %v1541_v43 = vpop.f32.mrb[6].mxu1 }
 0x432   : > { %v1542_v47 = vadd.f32 %v1541_v43, %v1470_v7  ;;  %v1543_v53 = vpop.f32.mrb[7].mxu1 }
 0x433   : > { %v1544_v50 = vadd.f32 %v1543_v53, %v1470_v7 }
 0x434   : > { %vm1546_vm1 = vcmp.ge.f32.partialorder %v1542_v47, 0.0  ;;  %v1548_v62 = vmul.f32 0.01, %v1542_v47 }
 0x435   : > { %vm1547_vm2 = vcmp.ge.f32.partialorder %v1544_v50, 0.0  ;;  %v1549_v63 = vmul.f32 0.01, %v1544_v50 }
 0x436   : > { %v1550_v1 = vsel %vm1546_vm1, %v1542_v47, %v1548_v62 }
 0x437   : > { %1815 = vst [vmem:[%s2975_s24 + $0x20] sm:$0xff] %v1550_v1  ;;  %v1551_v33 = vsel %vm1547_vm2, %v1544_v50, %v1549_v63 }
 0x438   : > { %1816 = vst [vmem:[%s2975_s24 + $0x28] sm:$0xff] %v1551_v33 }
 0x439   : > { %2212 = shalt.err (!%p2209_p7)
}
 0x43a   : > { %s2213_s23 = scalar_lea.hbm %s2988_s17, 1024  ;;  %s2217_s18 = scalar_lea.hbm %s3053_s15, 2048 }
 0x43b   : > { %p2214_p8 = scmp.ne.s32.totalorder %s2988_s17, %s2213_s23  ;;  %p2218_p1 = scmp.lt.u32.totalorder %s2988_s17, %s3053_s15 }
 0x43c   : > { %p2219_p0 = scmp.lt.u32.totalorder %s2217_s18, %s2213_s23  ;;  %p2221_p6 = scmp.lt.u32.totalorder %s2213_s23, %s2988_s17 }
 0x43d   : > { %p2215_p11 = pnand %p2214_p8, %p3083_p9 }
 0x43e   : > { %p2220_p5 = por %p2219_p0, %p2218_p1 }
 0x43f   : > { %p2216_p13 = pneg %p2215_p11 }
 0x440   : > { %p2222_p10 = por %p2221_p6, %p2220_p5 }
 0x442   : > { %p2223_p12 = pnand %p2222_p10, %p2216_p13 }
 0x444   : > { %2226 = shalt.err (!%p2223_p12)
}
 0x445   : > { %s2297_s27 = smov 256  }
 0x446   : > { %2093 = dma.vmem_to_hbm [thread:$0]  (%p3083_p9), %s2990_s20, 1024, %s2988_s17, %s2996_s22, %s2297_s27, %s2297_s27, %s2272_s25  }
 0x447 PF: > { %s3084_s16 = sld [smem:[#allocation8_spill]]  ;;  %s3085_s24 = sld [smem:[#allocation12_spill]] }
 0x448   : > { %p2105_p2 = scmp.ge.s32.totalorder %s2265_s21, 2 }
 0x44d   : > { %s1848_s26 = sand.u32 1, %s3084_s16   ;;  %p3086_p3 = scmp.ne.s32.totalorder %s3085_s24, 0 }
 0x44e   : > { %s1849_s23 = scalar_lea.sflag [#allocation4], %s1848_s26 }
 0x44f   : > { %p2100_p4 = pnand %p2105_p2, %p3086_p3 }
 0x451   : > { %2248 = dma.done.wait (!%p2100_p4), %s1849_s23, 1024  }
 0x452   : > { %2250 = vsyncadd (!%p2100_p4), %s1849_s23, 4294966272  ;;  %s3087_s21 = sld [smem:[#allocation10_spill]]  ;;  %s3088_s29 = sld [smem:[#allocation9_spill]] }
 0x453   : > { %s3089_s20 = sld [smem:[#allocation11_spill]]  ;;  %s3090_s18 = smov %s2257_s19 }
 0x458   : > { %p26_p7 = scmp.ge.s32.totalorder %s3087_s21, 4   ;;  %s3091_s19 = smov %s3088_s29 }
 0x45a   :  { %28 = sbr.rel (!%p26_p7) target bundleno = 4 (0x4), region = 144 }
 0x461   :  { %1854 = vsyncpa [#allocation3], 1 }
 0x462   :  { %1856 = vsyncpa [#allocation3 + $0x1], 1 }
 0x463   :  { %1857 = vsyncpa [#allocation4], 1 }
 0x464   :  { %1859 = vsyncpa [#allocation4 + $0x1], 1 }

</bundles_post_ra>
